<compile_context>
chip_gen: v6e
topology: v6e:2x2x1
jax: 0.10.0
libtpu: 0.0.40
codegen_flags: <defaults>
</compile_context>

<pallas_src>
import functools

import jax
import jax.numpy as jnp
from jax import lax
from jax.experimental import pallas as pl
from jax.experimental.pallas import tpu as pltpu


def _round_up(x, m):
    return (x + m - 1) // m * m


# --------------------------------------------------------------------------
# Bottleneck block (classifier / resnet50 layer4 identity block)
# --------------------------------------------------------------------------
def _fold_bn_into_conv(params, eps=1e-5):
    """Fold eval-mode BN scale into the conv weights (matmul layouts)."""

    def fold(g, b, m, v):
        s = g / jnp.sqrt(v + eps)
        return s, b - m * s

    s1, b1 = fold(*params['bn1'])
    s2, b2 = fold(*params['bn2'])
    s3, b3 = fold(*params['bn3'])
    w1 = params['w1'][:, :, 0, 0].T * s1[None, :]                 # (Cin, P)
    w2 = jnp.transpose(params['w2'], (2, 3, 1, 0)) * s2           # (3,3,P,P)
    w3 = params['w3'][:, :, 0, 0].T * s3[None, :]                 # (P, Cout)
    return (w1, b1), (w2, b2), (w3, b3)


def _bottleneck_kernel(H, W, TH, x_ref, w1_ref, b1_ref, w2_ref, b2_ref,
                       w3_ref, b3_ref, o_ref):
    """One grid step == one (roi/batch, row-tile).  Channels are lane-dense."""
    t = pl.program_id(1)
    EXT = (TH + 4) * W              # row tile + 2-row halo on each side
    OUT = TH * W

    start = pl.multiple_of(t * OUT, 8)
    x_ext = x_ref[0, pl.ds(start, EXT), :]                        # (EXT, Cp) f32

    # conv1 (1x1, BN scale folded into weight) + bias + ReLU (incl. halo rows)
    o1 = jnp.dot(x_ext.astype(jnp.bfloat16), w1_ref[...],
                 preferred_element_type=jnp.float32)
    o1 = jnp.maximum(o1 + b1_ref[...], 0.0).astype(jnp.bfloat16)  # (EXT, Pp)

    # conv2 (3x3, pad=1) as im2col: 9 shifted views of o1 + image-edge masks,
    # concatenated along lanes -> a single fat MXU matmul with K = 9*Pp.
    q = lax.broadcasted_iota(jnp.int32, (OUT, 1), 0)
    if W & (W - 1) == 0:                      # power-of-two W -> cheap bit ops
        r = jnp.right_shift(q, W.bit_length() - 1)
        c = jnp.bitwise_and(q, W - 1)
    else:
        r = q // W
        c = q % W
    y = t * TH + r                            # global output row

    taps = []
    for ky in range(3):
        for kx in range(3):
            dy, dx = ky - 1, kx - 1
            lo = 2 * W + dy * W + dx
            piece = o1[lo:lo + OUT, :]        # static, in-bounds view
            valid = ((y + dy >= 0) & (y + dy < H) &
                     (c + dx >= 0) & (c + dx < W))
            taps.append(jnp.where(valid, piece, 0))
    patches = jnp.concatenate(taps, axis=1)                       # (OUT, 9*Pp)
    o2 = jnp.dot(patches, w2_ref[...], preferred_element_type=jnp.float32)
    o2 = jnp.maximum(o2 + b2_ref[...], 0.0).astype(jnp.bfloat16)  # (OUT, Pp)

    # conv3 (1x1, BN folded) + bias + residual add + ReLU.
    o3 = jnp.dot(o2, w3_ref[...], preferred_element_type=jnp.float32)
    res = x_ext[2 * W:2 * W + OUT, :]                             # f32 identity
    o_ref[0] = jnp.maximum(o3 + b3_ref[...] + res, 0.0).astype(o_ref.dtype)


def bottleneck_forward(x_nchw, params, *, tile_h=None):
    N, Cin, H, W = x_nchw.shape
    P = params['w1'].shape[0]          # planes
    Cout = params['w3'].shape[0]       # planes * 4
    assert Cout == Cin, "residual add requires inplanes == planes * 4"
    # TODO(synk): widths not divisible by 8 would need zero column padding.
    assert W % 8 == 0, "W must be a multiple of 8 (sublane alignment)"

    LANE = 128
    Pp = _round_up(P, LANE)
    Cp = _round_up(Cin, LANE)          # == padded Cout

    (w1, b1), (w2, b2), (w3, b3) = _fold_bn_into_conv(params)

    # Zero-pad channels to the lane width, cast matmul weights to bf16.
    w1p = jnp.zeros((Cp, Pp), jnp.float32).at[:Cin, :P].set(w1)
    w1p = w1p.astype(jnp.bfloat16)
    w2p = jnp.zeros((3, 3, Pp, Pp), jnp.float32).at[:, :, :P, :P].set(w2)
    w2p = w2p.reshape(9 * Pp, Pp).astype(jnp.bfloat16)
    w3p = jnp.zeros((Pp, Cp), jnp.float32).at[:P, :Cout].set(w3)
    w3p = w3p.astype(jnp.bfloat16)
    b1p = jnp.zeros((1, Pp), jnp.float32).at[0, :P].set(b1)
    b2p = jnp.zeros((1, Pp), jnp.float32).at[0, :P].set(b2)
    b3p = jnp.zeros((1, Cp), jnp.float32).at[0, :Cout].set(b3)

    # NCHW -> NHWC, pad channels to Cp, pad H by 2 zero rows on each side
    # (conv2 halo), flatten to (N, (H+4)*W, Cp).  Residual path stays f32.
    x_nhwc = jnp.transpose(x_nchw, (0, 2, 3, 1))
    x_pad = jnp.pad(x_nhwc, ((0, 0), (2, 2), (0, 0), (0, Cp - Cin)))
    x_flat = x_pad.reshape(N, (H + 4) * W, Cp).astype(jnp.float32)

    if tile_h is None:
        tile_h = H // 2 if (H % 2 == 0 and ((H // 2) * W) % 8 == 0) else H
    TH = tile_h
    assert H % TH == 0 and (TH * W) % 8 == 0
    HT = H // TH

    kernel = functools.partial(_bottleneck_kernel, H, W, TH)

    def const(shape):
        return pl.BlockSpec(shape, lambda n, t: (0,) * len(shape))

    out_flat = pl.pallas_call(
        kernel,
        out_shape=jax.ShapeDtypeStruct((N, H * W, Cp), jnp.float32),
        grid_spec=pltpu.PrefetchScalarGridSpec(
            num_scalar_prefetch=0,
            grid=(N, HT),
            in_specs=[
                # Full H-padded image stays resident across the row tiles
                # (index map ignores t); halo rows are sliced in-kernel.
                pl.BlockSpec((1, (H + 4) * W, Cp), lambda n, t: (n, 0, 0)),
                const((Cp, Pp)), const((1, Pp)),
                const((9 * Pp, Pp)), const((1, Pp)),
                const((Pp, Cp)), const((1, Cp)),
            ],
            out_specs=pl.BlockSpec((1, TH * W, Cp), lambda n, t: (n, t, 0)),
        ),
        compiler_params=pltpu.CompilerParams(
            dimension_semantics=("parallel", "parallel"),
            vmem_limit_bytes=32 * 1024 * 1024),
    )(x_flat, w1p, b1p, w2p, b2p, w3p, b3p)

    out = out_flat[:, :, :Cout].reshape(N, H, W, Cout)
    return jnp.transpose(out, (0, 3, 1, 2))


# --------------------------------------------------------------------------
# Fused global average pool + cls_loc / score Linear heads
# --------------------------------------------------------------------------
def _roi_head_kernel(f_ref, wl_ref, bl_ref, ws_ref, bs_ref, loc_ref, sco_ref):
    f = f_ref[...]                                     # (TR, HW, Cp) f32
    pooled = jnp.mean(f, axis=1)                       # (TR, Cp)
    p = pooled.astype(jnp.bfloat16)
    loc = jnp.dot(p, wl_ref[...], preferred_element_type=jnp.float32)
    sco = jnp.dot(p, ws_ref[...], preferred_element_type=jnp.float32)
    loc_ref[...] = (loc + bl_ref[...]).astype(loc_ref.dtype)
    sco_ref[...] = (sco + bs_ref[...]).astype(sco_ref.dtype)


def roi_head_linear_forward(feat_nchw, w_loc, b_loc, w_score, b_score,
                            *, tile_r=8):
    R, C, H, W = feat_nchw.shape
    HW = H * W
    assert HW % 8 == 0
    LANE = 128
    Cp = _round_up(C, LANE)
    L, S = w_loc.shape[0], w_score.shape[0]
    Lp, Sp = _round_up(L, LANE), _round_up(S, LANE)
    Rp = _round_up(R, tile_r)

    # Lane-dense features: (R, HW, Cp), ROIs padded to the row tile.
    f = jnp.transpose(feat_nchw, (0, 2, 3, 1)).reshape(R, HW, C)
    f = jnp.pad(f, ((0, Rp - R), (0, 0), (0, Cp - C))).astype(jnp.float32)
    wl = jnp.zeros((Cp, Lp), jnp.float32).at[:C, :L].set(w_loc.T)
    wl = wl.astype(jnp.bfloat16)
    ws = jnp.zeros((Cp, Sp), jnp.float32).at[:C, :S].set(w_score.T)
    ws = ws.astype(jnp.bfloat16)
    bl = jnp.zeros((1, Lp), jnp.float32).at[0, :L].set(b_loc)
    bs = jnp.zeros((1, Sp), jnp.float32).at[0, :S].set(b_score)

    def const(shape):
        return pl.BlockSpec(shape, lambda r: (0,) * len(shape))

    loc, sco = pl.pallas_call(
        _roi_head_kernel,
        out_shape=(jax.ShapeDtypeStruct((Rp, Lp), jnp.float32),
                   jax.ShapeDtypeStruct((Rp, Sp), jnp.float32)),
        grid_spec=pltpu.PrefetchScalarGridSpec(
            num_scalar_prefetch=0,
            grid=(Rp // tile_r,),
            in_specs=[
                pl.BlockSpec((tile_r, HW, Cp), lambda r: (r, 0, 0)),
                const((Cp, Lp)), const((1, Lp)),
                const((Cp, Sp)), const((1, Sp)),
            ],
            out_specs=[pl.BlockSpec((tile_r, Lp), lambda r: (r, 0)),
                       pl.BlockSpec((tile_r, Sp), lambda r: (r, 0))],
        ),
        compiler_params=pltpu.CompilerParams(
            dimension_semantics=("parallel",),
            vmem_limit_bytes=32 * 1024 * 1024),
    )(f, wl, bl, ws, bs)
    return loc[:R, :L], sco[:R, :S]


# --------------------------------------------------------------------------
# RoIPool (plain JAX) + full RoI-head forward / references
# --------------------------------------------------------------------------
def roi_pool_jax(x_nchw, rois_fm, roi_indices, out_size, spatial_scale=1.0):
    """torchvision-style RoIPool: quantized bins, max per bin, empty bin -> 0.
    TODO(synk): per-ROI data-dependent gather/max left to XLA (not Pallas)."""
    N, C, H, W = x_nchw.shape
    R = rois_fm.shape[0]
    P = out_size
    x1 = jnp.round(rois_fm[:, 0] * spatial_scale).astype(jnp.int32)
    y1 = jnp.round(rois_fm[:, 1] * spatial_scale).astype(jnp.int32)
    x2 = jnp.round(rois_fm[:, 2] * spatial_scale).astype(jnp.int32)
    y2 = jnp.round(rois_fm[:, 3] * spatial_scale).astype(jnp.int32)
    roi_h = jnp.maximum(y2 - y1 + 1, 1).astype(jnp.float32)
    roi_w = jnp.maximum(x2 - x1 + 1, 1).astype(jnp.float32)
    bin_h = roi_h / P
    bin_w = roi_w / P
    i = jnp.arange(P, dtype=jnp.float32)
    hs = jnp.clip(jnp.floor(i[None] * bin_h[:, None]).astype(jnp.int32)
                  + y1[:, None], 0, H)
    he = jnp.clip(jnp.ceil((i[None] + 1) * bin_h[:, None]).astype(jnp.int32)
                  + y1[:, None], 0, H)
    wsb = jnp.clip(jnp.floor(i[None] * bin_w[:, None]).astype(jnp.int32)
                   + x1[:, None], 0, W)
    web = jnp.clip(jnp.ceil((i[None] + 1) * bin_w[:, None]).astype(jnp.int32)
                   + x1[:, None], 0, W)
    ys = jnp.arange(H)[None, None, :]
    xs = jnp.arange(W)[None, None, :]
    hmask = (ys >= hs[:, :, None]) & (ys < he[:, :, None])        # (R,P,H)
    wmask = (xs >= wsb[:, :, None]) & (xs < web[:, :, None])      # (R,P,W)
    mask = hmask[:, :, None, :, None] & wmask[:, None, :, None, :]  # (R,P,P,H,W)
    feat = x_nchw[roi_indices]                                    # (R,C,H,W)
    vals = jnp.where(mask[:, None], feat[:, :, None, None], -jnp.inf)
    pooled = jnp.max(vals.reshape(R, C, P, P, H * W), axis=-1)
    empty = ~jnp.any(mask.reshape(R, P, P, H * W), axis=-1)
    return jnp.where(empty[:, None], 0.0, pooled)                 # (R,C,P,P)


def _rois_to_feature_map(rois, roi_indices, img_size, fh, fw):
    rois_f = rois.reshape(-1, 4).astype(jnp.float32)
    idx_f = roi_indices.reshape(-1).astype(jnp.int32)
    fm = jnp.stack([rois_f[:, 0] / img_size[1] * fw,
                    rois_f[:, 1] / img_size[0] * fh,
                    rois_f[:, 2] / img_size[1] * fw,
                    rois_f[:, 3] / img_size[0] * fh], axis=1)
    return fm, idx_f


def resnet50_roi_head_forward(x, rois, roi_indices, img_size, params):
    """Forward pass of Resnet50RoIHead with Pallas classifier / head kernels."""
    n = x.shape[0]
    fm, idx = _rois_to_feature_map(rois, roi_indices, img_size,
                                   x.shape[2], x.shape[3])
    pool = roi_pool_jax(x, fm, idx, params['roi_size'])
    feat = bottleneck_forward(pool, params['block'])               # classifier
    loc, sco = roi_head_linear_forward(
        feat, params['w_cls_loc'], params['b_cls_loc'],
        params['w_score'], params['b_score'])
    return (loc.reshape(n, -1, loc.shape[1]),
            sco.reshape(n, -1, sco.shape[1]))


def reference_forward(x, params):
    """Pure-f32 XLA reference mirroring the PyTorch Bottleneck forward."""
    eps = 1e-5

    def bn(y, g, b, m, v):
        s = g / jnp.sqrt(v + eps)
        return y * s[None, :, None, None] + (b - m * s)[None, :, None, None]

    dn = ('NCHW', 'OIHW', 'NCHW')
    hi = lax.Precision.HIGHEST
    o = lax.conv_general_dilated(x, params['w1'], (1, 1), 'VALID',
                                 dimension_numbers=dn, precision=hi)
    o = jnp.maximum(bn(o, *params['bn1']), 0.0)
    o = lax.conv_general_dilated(o, params['w2'], (1, 1), ((1, 1), (1, 1)),
                                 dimension_numbers=dn, precision=hi)
    o = jnp.maximum(bn(o, *params['bn2']), 0.0)
    o = lax.conv_general_dilated(o, params['w3'], (1, 1), 'VALID',
                                 dimension_numbers=dn, precision=hi)
    o = bn(o, *params['bn3'])
    return jnp.maximum(o + x, 0.0)


def reference_forward_bf16(x, params):
    """Mixed-precision reference: identical BN folding and bf16 rounding of
    the matmul operands as the Pallas kernel, f32 accumulation via XLA."""
    (w1, b1), (w2, b2), (w3, b3) = _fold_bn_into_conv(params)
    rb = lambda a: a.astype(jnp.bfloat16).astype(jnp.float32)
    dn = ('NCHW', 'OIHW', 'NCHW')
    hi = lax.Precision.HIGHEST
    w1c = rb(w1).T[:, :, None, None]                 # (P, Cin, 1, 1)
    w2c = jnp.transpose(rb(w2), (3, 2, 0, 1))        # (P, P, 3, 3)
    w3c = rb(w3).T[:, :, None, None]                 # (Cout, P, 1, 1)
    o = lax.conv_general_dilated(rb(x), w1c, (1, 1), 'VALID',
                                 dimension_numbers=dn, precision=hi)
    o = jnp.maximum(o + b1[None, :, None, None], 0.0)
    o = lax.conv_general_dilated(rb(o), w2c, (1, 1), ((1, 1), (1, 1)),
                                 dimension_numbers=dn, precision=hi)
    o = jnp.maximum(o + b2[None, :, None, None], 0.0)
    o = lax.conv_general_dilated(rb(o), w3c, (1, 1), 'VALID',
                                 dimension_numbers=dn, precision=hi)
    o = o + b3[None, :, None, None]
    return jnp.maximum(o + x, 0.0)


def _heads_reference(feat_nchw, w_loc, b_loc, w_score, b_score, bf16_matched):
    pooled = jnp.mean(feat_nchw, axis=(2, 3))
    if bf16_matched:
        rb = lambda a: a.astype(jnp.bfloat16).astype(jnp.float32)
        pooled, w_loc, w_score = rb(pooled), rb(w_loc), rb(w_score)
    loc = pooled @ w_loc.T + b_loc[None]
    sco = pooled @ w_score.T + b_score[None]
    return loc, sco


def resnet50_roi_head_reference(x, rois, roi_indices, img_size, params,
                                *, bf16_matched=False):
    n = x.shape[0]
    fm, idx = _rois_to_feature_map(rois, roi_indices, img_size,
                                   x.shape[2], x.shape[3])
    pool = roi_pool_jax(x, fm, idx, params['roi_size'])
    block_ref = reference_forward_bf16 if bf16_matched else reference_forward
    feat = block_ref(pool, params['block'])
    loc, sco = _heads_reference(feat, params['w_cls_loc'], params['b_cls_loc'],
                                params['w_score'], params['b_score'],
                                bf16_matched)
    return (loc.reshape(n, -1, loc.shape[1]),
            sco.reshape(n, -1, sco.shape[1]))


if __name__ == "__main__":
    key = jax.random.PRNGKey(0)
    N, Cfeat, Hf, Wf = 2, 16, 16, 16     # feature map (Cfeat == planes*4)
    planes = 4
    roi_size = 8
    rois_per_image = 4
    n_class = 3
    img_size = (128, 128)

    ks = jax.random.split(key, 14)

    def bn_params(k, c):
        k1, k2, k3, k4 = jax.random.split(k, 4)
        return (jax.random.uniform(k1, (c,), minval=0.5, maxval=1.5),
                0.1 * jax.random.normal(k2, (c,)),
                0.1 * jax.random.normal(k3, (c,)),
                jax.random.uniform(k4, (c,), minval=0.5, maxval=1.5))

    block = {
        'w1': 0.2 * jax.random.normal(ks[0], (planes, Cfeat, 1, 1), jnp.float32),
        'w2': 0.2 * jax.random.normal(ks[1], (planes, planes, 3, 3), jnp.float32),
        'w3': 0.2 * jax.random.normal(ks[2], (planes * 4, planes, 1, 1),
                                      jnp.float32),
        'bn1': bn_params(ks[3], planes),
        'bn2': bn_params(ks[4], planes),
        'bn3': bn_params(ks[5], planes * 4),
    }
    params = {
        'roi_size': roi_size,
        'block': block,
        'w_cls_loc': 0.1 * jax.random.normal(ks[6], (n_class * 4, planes * 4),
                                             jnp.float32),
        'b_cls_loc': 0.05 * jax.random.normal(ks[7], (n_class * 4,), jnp.float32),
        'w_score': 0.1 * jax.random.normal(ks[8], (n_class, planes * 4),
                                           jnp.float32),
        'b_score': 0.05 * jax.random.normal(ks[9], (n_class,), jnp.float32),
    }

    x = jax.random.normal(ks[10], (N, Cfeat, Hf, Wf), jnp.float32)
    xs_c = jax.random.uniform(ks[11], (N, rois_per_image, 2),
                              minval=0.0, maxval=img_size[1] - 1.0)
    ys_c = jax.random.uniform(ks[12], (N, rois_per_image, 2),
                              minval=0.0, maxval=img_size[0] - 1.0)
    rois = jnp.stack([jnp.min(xs_c, -1), jnp.min(ys_c, -1),
                      jnp.max(xs_c, -1), jnp.max(ys_c, -1)], axis=-1)
    roi_indices = jnp.tile(jnp.arange(N, dtype=jnp.int32)[:, None],
                           (1, rois_per_image))

    # ---- run the Pallas forward -------------------------------------------
    loc, sco = jax.block_until_ready(
        resnet50_roi_head_forward(x, rois, roi_indices, img_size, params))
    assert loc.shape == (N, rois_per_image, n_class * 4)
    assert sco.shape == (N, rois_per_image, n_class)

    # ---- block-level check: Bottleneck kernel vs. XLA conv reference -------
    fm, idx = _rois_to_feature_map(rois, roi_indices, img_size, Hf, Wf)
    pool = roi_pool_jax(x, fm, idx, roi_size)
    blk_out = bottleneck_forward(pool, block)
    err_blk = float(jnp.max(jnp.abs(blk_out - reference_forward_bf16(pool,
                                                                     block))))
    assert err_blk < 1e-2, f"Bottleneck mismatch vs bf16-matched ref: {err_blk}"

    # ---- end-to-end checks --------------------------------------------------
    loc_m, sco_m = resnet50_roi_head_reference(x, rois, roi_indices, img_size,
                                               params, bf16_matched=True)
    err_e2e = float(max(jnp.max(jnp.abs(loc - loc_m)),
                        jnp.max(jnp.abs(sco - sco_m))))
    assert err_e2e < 5e-2, f"RoI-head mismatch vs bf16-matched ref: {err_e2e}"

    loc_f, sco_f = resnet50_roi_head_reference(x, rois, roi_indices, img_size,
                                               params, bf16_matched=False)
    err_f32 = float(max(jnp.max(jnp.abs(loc - loc_f)),
                        jnp.max(jnp.abs(sco - sco_f))))
    assert err_f32 < 0.5, f"RoI-head mismatch vs f32 reference: {err_f32}"

    print("KERNEL_OK")
</pallas_src>

<mosaic_0001>
module attributes {stable_mosaic.version = 11 : i64} {
  func.func @_bottleneck_kernel(%arg0: i32, %arg1: i32, %arg2: memref<1x96x128xf32, #tpu.memory_space<vmem>>, %arg3: memref<128x128xbf16, #tpu.memory_space<vmem>>, %arg4: memref<1x128xf32, #tpu.memory_space<vmem>>, %arg5: memref<1152x128xbf16, #tpu.memory_space<vmem>>, %arg6: memref<1x128xf32, #tpu.memory_space<vmem>>, %arg7: memref<128x128xbf16, #tpu.memory_space<vmem>>, %arg8: memref<1x128xf32, #tpu.memory_space<vmem>>, %arg9: memref<1x32x128xf32, #tpu.memory_space<vmem>>) attributes {dimension_semantics = [#tpu.dimension_semantics<parallel>, #tpu.dimension_semantics<parallel>], iteration_bounds = array<i64: 8, 2>, scalar_prefetch = 0 : i64, scratch_operands = 0 : i64, tpu.core_type = #tpu.core_type<tc>, window_params = [{transform_indices = @transform_0, window_bounds = array<i64: 1, 96, 128>}, {pipeline_mode = #tpu.pipeline_mode<synchronous>, transform_indices = @transform_1, window_bounds = array<i64: 128, 128>}, {pipeline_mode = #tpu.pipeline_mode<synchronous>, transform_indices = @transform_2, window_bounds = array<i64: 1, 128>}, {pipeline_mode = #tpu.pipeline_mode<synchronous>, transform_indices = @transform_3, window_bounds = array<i64: 1152, 128>}, {pipeline_mode = #tpu.pipeline_mode<synchronous>, transform_indices = @transform_4, window_bounds = array<i64: 1, 128>}, {pipeline_mode = #tpu.pipeline_mode<synchronous>, transform_indices = @transform_5, window_bounds = array<i64: 128, 128>}, {pipeline_mode = #tpu.pipeline_mode<synchronous>, transform_indices = @transform_6, window_bounds = array<i64: 1, 128>}, {transform_indices = @transform_7, window_bounds = array<i64: 1, 32, 128>}]} {
    %c32_i32 = arith.constant 32 : i32
    %0 = arith.muli %arg1, %c32_i32 : i32
    %1 = tpu.assume_multiple %0, 8 : i32
    %c0 = arith.constant 0 : index
    %2 = arith.index_cast %1 : i32 to index
    %c0_0 = arith.constant 0 : index
    %3 = vector.load %arg2[%c0, %2, %c0_0] : memref<1x96x128xf32, #tpu.memory_space<vmem>>, vector<1x64x128xf32>
    %4 = vector.shape_cast %3 : vector<1x64x128xf32> to vector<64x128xf32>
    %5 = arith.truncf %4 : vector<64x128xf32> to vector<64x128xbf16>
    %c0_1 = arith.constant 0 : index
    %c0_2 = arith.constant 0 : index
    %6 = vector.load %arg3[%c0_1, %c0_2] : memref<128x128xbf16, #tpu.memory_space<vmem>>, vector<128x128xbf16>
    %cst = arith.constant dense<0.000000e+00> : vector<64x128xf32>
    %7 = tpu.matmul %5, %6, %cst {dimension_numbers = #tpu.dot_dimension_numbers<[1], [0], [0], [1], [0, 0, 1, 1], [], []>} : vector<64x128xbf16>, vector<128x128xbf16>, vector<64x128xf32> -> vector<64x128xf32>
    %c0_3 = arith.constant 0 : index
    %c0_4 = arith.constant 0 : index
    %8 = vector.load %arg4[%c0_3, %c0_4] : memref<1x128xf32, #tpu.memory_space<vmem>>, vector<1x128xf32>
    %9 = vector.broadcast %8 : vector<1x128xf32> to vector<64x128xf32>
    %10 = arith.addf %7, %9 : vector<64x128xf32>
    %cst_5 = arith.constant 0.000000e+00 : f32
    %11 = vector.broadcast %cst_5 : f32 to vector<64x128xf32>
    %12 = arith.maximumf %10, %11 : vector<64x128xf32>
    %13 = arith.truncf %12 : vector<64x128xf32> to vector<64x128xbf16>
    %14 = tpu.iota {dimensions = array<i32: 0>} : vector<32x1xi32>
    %c3_i32 = arith.constant 3 : i32
    %15 = vector.broadcast %c3_i32 : i32 to vector<32x1xi32>
    %16 = arith.shrsi %14, %15 : vector<32x1xi32>
    %c7_i32 = arith.constant 7 : i32
    %17 = vector.broadcast %c7_i32 : i32 to vector<32x1xi32>
    %18 = arith.andi %14, %17 : vector<32x1xi32>
    %c4_i32 = arith.constant 4 : i32
    %19 = arith.muli %arg1, %c4_i32 : i32
    %20 = vector.broadcast %19 : i32 to vector<32x1xi32>
    %21 = arith.addi %20, %16 : vector<32x1xi32>
    %22 = vector.extract_strided_slice %13 {offsets = [7, 0], sizes = [32, 128], strides = [1, 1]} : vector<64x128xbf16> to vector<32x128xbf16>
    %c-1_i32 = arith.constant -1 : i32
    %23 = vector.broadcast %c-1_i32 : i32 to vector<32x1xi32>
    %24 = arith.addi %21, %23 : vector<32x1xi32>
    %c0_i32 = arith.constant 0 : i32
    %25 = vector.broadcast %c0_i32 : i32 to vector<32x1xi32>
    %26 = arith.cmpi sge, %24, %25 : vector<32x1xi32>
    %c-1_i32_6 = arith.constant -1 : i32
    %27 = vector.broadcast %c-1_i32_6 : i32 to vector<32x1xi32>
    %28 = arith.addi %21, %27 : vector<32x1xi32>
    %c8_i32 = arith.constant 8 : i32
    %29 = vector.broadcast %c8_i32 : i32 to vector<32x1xi32>
    %30 = arith.cmpi slt, %28, %29 : vector<32x1xi32>
    %31 = arith.andi %26, %30 : vector<32x1xi1>
    %c-1_i32_7 = arith.constant -1 : i32
    %32 = vector.broadcast %c-1_i32_7 : i32 to vector<32x1xi32>
    %33 = arith.addi %18, %32 : vector<32x1xi32>
    %c0_i32_8 = arith.constant 0 : i32
    %34 = vector.broadcast %c0_i32_8 : i32 to vector<32x1xi32>
    %35 = arith.cmpi sge, %33, %34 : vector<32x1xi32>
    %36 = arith.andi %31, %35 : vector<32x1xi1>
    %c-1_i32_9 = arith.constant -1 : i32
    %37 = vector.broadcast %c-1_i32_9 : i32 to vector<32x1xi32>
    %38 = arith.addi %18, %37 : vector<32x1xi32>
    %c8_i32_10 = arith.constant 8 : i32
    %39 = vector.broadcast %c8_i32_10 : i32 to vector<32x1xi32>
    %40 = arith.cmpi slt, %38, %39 : vector<32x1xi32>
    %41 = arith.andi %36, %40 : vector<32x1xi1>
    %c0_i32_11 = arith.constant 0 : i32
    %42 = arith.sitofp %c0_i32_11 : i32 to bf16
    %43 = vector.shape_cast %41 : vector<32x1xi1> to vector<32x1xi1>
    %44 = vector.broadcast %43 : vector<32x1xi1> to vector<32x128xi1>
    %45 = vector.broadcast %42 : bf16 to vector<32x128xbf16>
    %46 = arith.select %44, %22, %45 : vector<32x128xi1>, vector<32x128xbf16>
    %47 = vector.extract_strided_slice %13 {offsets = [8, 0], sizes = [32, 128], strides = [1, 1]} : vector<64x128xbf16> to vector<32x128xbf16>
    %c-1_i32_12 = arith.constant -1 : i32
    %48 = vector.broadcast %c-1_i32_12 : i32 to vector<32x1xi32>
    %49 = arith.addi %21, %48 : vector<32x1xi32>
    %c0_i32_13 = arith.constant 0 : i32
    %50 = vector.broadcast %c0_i32_13 : i32 to vector<32x1xi32>
    %51 = arith.cmpi sge, %49, %50 : vector<32x1xi32>
    %c-1_i32_14 = arith.constant -1 : i32
    %52 = vector.broadcast %c-1_i32_14 : i32 to vector<32x1xi32>
    %53 = arith.addi %21, %52 : vector<32x1xi32>
    %c8_i32_15 = arith.constant 8 : i32
    %54 = vector.broadcast %c8_i32_15 : i32 to vector<32x1xi32>
    %55 = arith.cmpi slt, %53, %54 : vector<32x1xi32>
    %56 = arith.andi %51, %55 : vector<32x1xi1>
    %c0_i32_16 = arith.constant 0 : i32
    %57 = vector.broadcast %c0_i32_16 : i32 to vector<32x1xi32>
    %58 = arith.addi %18, %57 : vector<32x1xi32>
    %c0_i32_17 = arith.constant 0 : i32
    %59 = vector.broadcast %c0_i32_17 : i32 to vector<32x1xi32>
    %60 = arith.cmpi sge, %58, %59 : vector<32x1xi32>
    %61 = arith.andi %56, %60 : vector<32x1xi1>
    %c0_i32_18 = arith.constant 0 : i32
    %62 = vector.broadcast %c0_i32_18 : i32 to vector<32x1xi32>
    %63 = arith.addi %18, %62 : vector<32x1xi32>
    %c8_i32_19 = arith.constant 8 : i32
    %64 = vector.broadcast %c8_i32_19 : i32 to vector<32x1xi32>
    %65 = arith.cmpi slt, %63, %64 : vector<32x1xi32>
    %66 = arith.andi %61, %65 : vector<32x1xi1>
    %c0_i32_20 = arith.constant 0 : i32
    %67 = arith.sitofp %c0_i32_20 : i32 to bf16
    %68 = vector.shape_cast %66 : vector<32x1xi1> to vector<32x1xi1>
    %69 = vector.broadcast %68 : vector<32x1xi1> to vector<32x128xi1>
    %70 = vector.broadcast %67 : bf16 to vector<32x128xbf16>
    %71 = arith.select %69, %47, %70 : vector<32x128xi1>, vector<32x128xbf16>
    %72 = vector.extract_strided_slice %13 {offsets = [9, 0], sizes = [32, 128], strides = [1, 1]} : vector<64x128xbf16> to vector<32x128xbf16>
    %c-1_i32_21 = arith.constant -1 : i32
    %73 = vector.broadcast %c-1_i32_21 : i32 to vector<32x1xi32>
    %74 = arith.addi %21, %73 : vector<32x1xi32>
    %c0_i32_22 = arith.constant 0 : i32
    %75 = vector.broadcast %c0_i32_22 : i32 to vector<32x1xi32>
    %76 = arith.cmpi sge, %74, %75 : vector<32x1xi32>
    %c-1_i32_23 = arith.constant -1 : i32
    %77 = vector.broadcast %c-1_i32_23 : i32 to vector<32x1xi32>
    %78 = arith.addi %21, %77 : vector<32x1xi32>
    %c8_i32_24 = arith.constant 8 : i32
    %79 = vector.broadcast %c8_i32_24 : i32 to vector<32x1xi32>
    %80 = arith.cmpi slt, %78, %79 : vector<32x1xi32>
    %81 = arith.andi %76, %80 : vector<32x1xi1>
    %c1_i32 = arith.constant 1 : i32
    %82 = vector.broadcast %c1_i32 : i32 to vector<32x1xi32>
    %83 = arith.addi %18, %82 : vector<32x1xi32>
    %c0_i32_25 = arith.constant 0 : i32
    %84 = vector.broadcast %c0_i32_25 : i32 to vector<32x1xi32>
    %85 = arith.cmpi sge, %83, %84 : vector<32x1xi32>
    %86 = arith.andi %81, %85 : vector<32x1xi1>
    %c1_i32_26 = arith.constant 1 : i32
    %87 = vector.broadcast %c1_i32_26 : i32 to vector<32x1xi32>
    %88 = arith.addi %18, %87 : vector<32x1xi32>
    %c8_i32_27 = arith.constant 8 : i32
    %89 = vector.broadcast %c8_i32_27 : i32 to vector<32x1xi32>
    %90 = arith.cmpi slt, %88, %89 : vector<32x1xi32>
    %91 = arith.andi %86, %90 : vector<32x1xi1>
    %c0_i32_28 = arith.constant 0 : i32
    %92 = arith.sitofp %c0_i32_28 : i32 to bf16
    %93 = vector.shape_cast %91 : vector<32x1xi1> to vector<32x1xi1>
    %94 = vector.broadcast %93 : vector<32x1xi1> to vector<32x128xi1>
    %95 = vector.broadcast %92 : bf16 to vector<32x128xbf16>
    %96 = arith.select %94, %72, %95 : vector<32x128xi1>, vector<32x128xbf16>
    %97 = vector.extract_strided_slice %13 {offsets = [15, 0], sizes = [32, 128], strides = [1, 1]} : vector<64x128xbf16> to vector<32x128xbf16>
    %c0_i32_29 = arith.constant 0 : i32
    %98 = vector.broadcast %c0_i32_29 : i32 to vector<32x1xi32>
    %99 = arith.addi %21, %98 : vector<32x1xi32>
    %c0_i32_30 = arith.constant 0 : i32
    %100 = vector.broadcast %c0_i32_30 : i32 to vector<32x1xi32>
    %101 = arith.cmpi sge, %99, %100 : vector<32x1xi32>
    %c0_i32_31 = arith.constant 0 : i32
    %102 = vector.broadcast %c0_i32_31 : i32 to vector<32x1xi32>
    %103 = arith.addi %21, %102 : vector<32x1xi32>
    %c8_i32_32 = arith.constant 8 : i32
    %104 = vector.broadcast %c8_i32_32 : i32 to vector<32x1xi32>
    %105 = arith.cmpi slt, %103, %104 : vector<32x1xi32>
    %106 = arith.andi %101, %105 : vector<32x1xi1>
    %c-1_i32_33 = arith.constant -1 : i32
    %107 = vector.broadcast %c-1_i32_33 : i32 to vector<32x1xi32>
    %108 = arith.addi %18, %107 : vector<32x1xi32>
    %c0_i32_34 = arith.constant 0 : i32
    %109 = vector.broadcast %c0_i32_34 : i32 to vector<32x1xi32>
    %110 = arith.cmpi sge, %108, %109 : vector<32x1xi32>
    %111 = arith.andi %106, %110 : vector<32x1xi1>
    %c-1_i32_35 = arith.constant -1 : i32
    %112 = vector.broadcast %c-1_i32_35 : i32 to vector<32x1xi32>
    %113 = arith.addi %18, %112 : vector<32x1xi32>
    %c8_i32_36 = arith.constant 8 : i32
    %114 = vector.broadcast %c8_i32_36 : i32 to vector<32x1xi32>
    %115 = arith.cmpi slt, %113, %114 : vector<32x1xi32>
    %116 = arith.andi %111, %115 : vector<32x1xi1>
    %c0_i32_37 = arith.constant 0 : i32
    %117 = arith.sitofp %c0_i32_37 : i32 to bf16
    %118 = vector.shape_cast %116 : vector<32x1xi1> to vector<32x1xi1>
    %119 = vector.broadcast %118 : vector<32x1xi1> to vector<32x128xi1>
    %120 = vector.broadcast %117 : bf16 to vector<32x128xbf16>
    %121 = arith.select %119, %97, %120 : vector<32x128xi1>, vector<32x128xbf16>
    %122 = vector.extract_strided_slice %13 {offsets = [16, 0], sizes = [32, 128], strides = [1, 1]} : vector<64x128xbf16> to vector<32x128xbf16>
    %c0_i32_38 = arith.constant 0 : i32
    %123 = vector.broadcast %c0_i32_38 : i32 to vector<32x1xi32>
    %124 = arith.addi %21, %123 : vector<32x1xi32>
    %c0_i32_39 = arith.constant 0 : i32
    %125 = vector.broadcast %c0_i32_39 : i32 to vector<32x1xi32>
    %126 = arith.cmpi sge, %124, %125 : vector<32x1xi32>
    %c0_i32_40 = arith.constant 0 : i32
    %127 = vector.broadcast %c0_i32_40 : i32 to vector<32x1xi32>
    %128 = arith.addi %21, %127 : vector<32x1xi32>
    %c8_i32_41 = arith.constant 8 : i32
    %129 = vector.broadcast %c8_i32_41 : i32 to vector<32x1xi32>
    %130 = arith.cmpi slt, %128, %129 : vector<32x1xi32>
    %131 = arith.andi %126, %130 : vector<32x1xi1>
    %c0_i32_42 = arith.constant 0 : i32
    %132 = vector.broadcast %c0_i32_42 : i32 to vector<32x1xi32>
    %133 = arith.addi %18, %132 : vector<32x1xi32>
    %c0_i32_43 = arith.constant 0 : i32
    %134 = vector.broadcast %c0_i32_43 : i32 to vector<32x1xi32>
    %135 = arith.cmpi sge, %133, %134 : vector<32x1xi32>
    %136 = arith.andi %131, %135 : vector<32x1xi1>
    %c0_i32_44 = arith.constant 0 : i32
    %137 = vector.broadcast %c0_i32_44 : i32 to vector<32x1xi32>
    %138 = arith.addi %18, %137 : vector<32x1xi32>
    %c8_i32_45 = arith.constant 8 : i32
    %139 = vector.broadcast %c8_i32_45 : i32 to vector<32x1xi32>
    %140 = arith.cmpi slt, %138, %139 : vector<32x1xi32>
    %141 = arith.andi %136, %140 : vector<32x1xi1>
    %c0_i32_46 = arith.constant 0 : i32
    %142 = arith.sitofp %c0_i32_46 : i32 to bf16
    %143 = vector.shape_cast %141 : vector<32x1xi1> to vector<32x1xi1>
    %144 = vector.broadcast %143 : vector<32x1xi1> to vector<32x128xi1>
    %145 = vector.broadcast %142 : bf16 to vector<32x128xbf16>
    %146 = arith.select %144, %122, %145 : vector<32x128xi1>, vector<32x128xbf16>
    %147 = vector.extract_strided_slice %13 {offsets = [17, 0], sizes = [32, 128], strides = [1, 1]} : vector<64x128xbf16> to vector<32x128xbf16>
    %c0_i32_47 = arith.constant 0 : i32
    %148 = vector.broadcast %c0_i32_47 : i32 to vector<32x1xi32>
    %149 = arith.addi %21, %148 : vector<32x1xi32>
    %c0_i32_48 = arith.constant 0 : i32
    %150 = vector.broadcast %c0_i32_48 : i32 to vector<32x1xi32>
    %151 = arith.cmpi sge, %149, %150 : vector<32x1xi32>
    %c0_i32_49 = arith.constant 0 : i32
    %152 = vector.broadcast %c0_i32_49 : i32 to vector<32x1xi32>
    %153 = arith.addi %21, %152 : vector<32x1xi32>
    %c8_i32_50 = arith.constant 8 : i32
    %154 = vector.broadcast %c8_i32_50 : i32 to vector<32x1xi32>
    %155 = arith.cmpi slt, %153, %154 : vector<32x1xi32>
    %156 = arith.andi %151, %155 : vector<32x1xi1>
    %c1_i32_51 = arith.constant 1 : i32
    %157 = vector.broadcast %c1_i32_51 : i32 to vector<32x1xi32>
    %158 = arith.addi %18, %157 : vector<32x1xi32>
    %c0_i32_52 = arith.constant 0 : i32
    %159 = vector.broadcast %c0_i32_52 : i32 to vector<32x1xi32>
    %160 = arith.cmpi sge, %158, %159 : vector<32x1xi32>
    %161 = arith.andi %156, %160 : vector<32x1xi1>
    %c1_i32_53 = arith.constant 1 : i32
    %162 = vector.broadcast %c1_i32_53 : i32 to vector<32x1xi32>
    %163 = arith.addi %18, %162 : vector<32x1xi32>
    %c8_i32_54 = arith.constant 8 : i32
    %164 = vector.broadcast %c8_i32_54 : i32 to vector<32x1xi32>
    %165 = arith.cmpi slt, %163, %164 : vector<32x1xi32>
    %166 = arith.andi %161, %165 : vector<32x1xi1>
    %c0_i32_55 = arith.constant 0 : i32
    %167 = arith.sitofp %c0_i32_55 : i32 to bf16
    %168 = vector.shape_cast %166 : vector<32x1xi1> to vector<32x1xi1>
    %169 = vector.broadcast %168 : vector<32x1xi1> to vector<32x128xi1>
    %170 = vector.broadcast %167 : bf16 to vector<32x128xbf16>
    %171 = arith.select %169, %147, %170 : vector<32x128xi1>, vector<32x128xbf16>
    %172 = vector.extract_strided_slice %13 {offsets = [23, 0], sizes = [32, 128], strides = [1, 1]} : vector<64x128xbf16> to vector<32x128xbf16>
    %c1_i32_56 = arith.constant 1 : i32
    %173 = vector.broadcast %c1_i32_56 : i32 to vector<32x1xi32>
    %174 = arith.addi %21, %173 : vector<32x1xi32>
    %c0_i32_57 = arith.constant 0 : i32
    %175 = vector.broadcast %c0_i32_57 : i32 to vector<32x1xi32>
    %176 = arith.cmpi sge, %174, %175 : vector<32x1xi32>
    %c1_i32_58 = arith.constant 1 : i32
    %177 = vector.broadcast %c1_i32_58 : i32 to vector<32x1xi32>
    %178 = arith.addi %21, %177 : vector<32x1xi32>
    %c8_i32_59 = arith.constant 8 : i32
    %179 = vector.broadcast %c8_i32_59 : i32 to vector<32x1xi32>
    %180 = arith.cmpi slt, %178, %179 : vector<32x1xi32>
    %181 = arith.andi %176, %180 : vector<32x1xi1>
    %c-1_i32_60 = arith.constant -1 : i32
    %182 = vector.broadcast %c-1_i32_60 : i32 to vector<32x1xi32>
    %183 = arith.addi %18, %182 : vector<32x1xi32>
    %c0_i32_61 = arith.constant 0 : i32
    %184 = vector.broadcast %c0_i32_61 : i32 to vector<32x1xi32>
    %185 = arith.cmpi sge, %183, %184 : vector<32x1xi32>
    %186 = arith.andi %181, %185 : vector<32x1xi1>
    %c-1_i32_62 = arith.constant -1 : i32
    %187 = vector.broadcast %c-1_i32_62 : i32 to vector<32x1xi32>
    %188 = arith.addi %18, %187 : vector<32x1xi32>
    %c8_i32_63 = arith.constant 8 : i32
    %189 = vector.broadcast %c8_i32_63 : i32 to vector<32x1xi32>
    %190 = arith.cmpi slt, %188, %189 : vector<32x1xi32>
    %191 = arith.andi %186, %190 : vector<32x1xi1>
    %c0_i32_64 = arith.constant 0 : i32
    %192 = arith.sitofp %c0_i32_64 : i32 to bf16
    %193 = vector.shape_cast %191 : vector<32x1xi1> to vector<32x1xi1>
    %194 = vector.broadcast %193 : vector<32x1xi1> to vector<32x128xi1>
    %195 = vector.broadcast %192 : bf16 to vector<32x128xbf16>
    %196 = arith.select %194, %172, %195 : vector<32x128xi1>, vector<32x128xbf16>
    %197 = vector.extract_strided_slice %13 {offsets = [24, 0], sizes = [32, 128], strides = [1, 1]} : vector<64x128xbf16> to vector<32x128xbf16>
    %c1_i32_65 = arith.constant 1 : i32
    %198 = vector.broadcast %c1_i32_65 : i32 to vector<32x1xi32>
    %199 = arith.addi %21, %198 : vector<32x1xi32>
    %c0_i32_66 = arith.constant 0 : i32
    %200 = vector.broadcast %c0_i32_66 : i32 to vector<32x1xi32>
    %201 = arith.cmpi sge, %199, %200 : vector<32x1xi32>
    %c1_i32_67 = arith.constant 1 : i32
    %202 = vector.broadcast %c1_i32_67 : i32 to vector<32x1xi32>
    %203 = arith.addi %21, %202 : vector<32x1xi32>
    %c8_i32_68 = arith.constant 8 : i32
    %204 = vector.broadcast %c8_i32_68 : i32 to vector<32x1xi32>
    %205 = arith.cmpi slt, %203, %204 : vector<32x1xi32>
    %206 = arith.andi %201, %205 : vector<32x1xi1>
    %c0_i32_69 = arith.constant 0 : i32
    %207 = vector.broadcast %c0_i32_69 : i32 to vector<32x1xi32>
    %208 = arith.addi %18, %207 : vector<32x1xi32>
    %c0_i32_70 = arith.constant 0 : i32
    %209 = vector.broadcast %c0_i32_70 : i32 to vector<32x1xi32>
    %210 = arith.cmpi sge, %208, %209 : vector<32x1xi32>
    %211 = arith.andi %206, %210 : vector<32x1xi1>
    %c0_i32_71 = arith.constant 0 : i32
    %212 = vector.broadcast %c0_i32_71 : i32 to vector<32x1xi32>
    %213 = arith.addi %18, %212 : vector<32x1xi32>
    %c8_i32_72 = arith.constant 8 : i32
    %214 = vector.broadcast %c8_i32_72 : i32 to vector<32x1xi32>
    %215 = arith.cmpi slt, %213, %214 : vector<32x1xi32>
    %216 = arith.andi %211, %215 : vector<32x1xi1>
    %c0_i32_73 = arith.constant 0 : i32
    %217 = arith.sitofp %c0_i32_73 : i32 to bf16
    %218 = vector.shape_cast %216 : vector<32x1xi1> to vector<32x1xi1>
    %219 = vector.broadcast %218 : vector<32x1xi1> to vector<32x128xi1>
    %220 = vector.broadcast %217 : bf16 to vector<32x128xbf16>
    %221 = arith.select %219, %197, %220 : vector<32x128xi1>, vector<32x128xbf16>
    %222 = vector.extract_strided_slice %13 {offsets = [25, 0], sizes = [32, 128], strides = [1, 1]} : vector<64x128xbf16> to vector<32x128xbf16>
    %c1_i32_74 = arith.constant 1 : i32
    %223 = vector.broadcast %c1_i32_74 : i32 to vector<32x1xi32>
    %224 = arith.addi %21, %223 : vector<32x1xi32>
    %c0_i32_75 = arith.constant 0 : i32
    %225 = vector.broadcast %c0_i32_75 : i32 to vector<32x1xi32>
    %226 = arith.cmpi sge, %224, %225 : vector<32x1xi32>
    %c1_i32_76 = arith.constant 1 : i32
    %227 = vector.broadcast %c1_i32_76 : i32 to vector<32x1xi32>
    %228 = arith.addi %21, %227 : vector<32x1xi32>
    %c8_i32_77 = arith.constant 8 : i32
    %229 = vector.broadcast %c8_i32_77 : i32 to vector<32x1xi32>
    %230 = arith.cmpi slt, %228, %229 : vector<32x1xi32>
    %231 = arith.andi %226, %230 : vector<32x1xi1>
    %c1_i32_78 = arith.constant 1 : i32
    %232 = vector.broadcast %c1_i32_78 : i32 to vector<32x1xi32>
    %233 = arith.addi %18, %232 : vector<32x1xi32>
    %c0_i32_79 = arith.constant 0 : i32
    %234 = vector.broadcast %c0_i32_79 : i32 to vector<32x1xi32>
    %235 = arith.cmpi sge, %233, %234 : vector<32x1xi32>
    %236 = arith.andi %231, %235 : vector<32x1xi1>
    %c1_i32_80 = arith.constant 1 : i32
    %237 = vector.broadcast %c1_i32_80 : i32 to vector<32x1xi32>
    %238 = arith.addi %18, %237 : vector<32x1xi32>
    %c8_i32_81 = arith.constant 8 : i32
    %239 = vector.broadcast %c8_i32_81 : i32 to vector<32x1xi32>
    %240 = arith.cmpi slt, %238, %239 : vector<32x1xi32>
    %241 = arith.andi %236, %240 : vector<32x1xi1>
    %c0_i32_82 = arith.constant 0 : i32
    %242 = arith.sitofp %c0_i32_82 : i32 to bf16
    %243 = vector.shape_cast %241 : vector<32x1xi1> to vector<32x1xi1>
    %244 = vector.broadcast %243 : vector<32x1xi1> to vector<32x128xi1>
    %245 = vector.broadcast %242 : bf16 to vector<32x128xbf16>
    %246 = arith.select %244, %222, %245 : vector<32x128xi1>, vector<32x128xbf16>
    %247 = tpu.concatenate %46, %71, %96, %121, %146, %171, %196, %221, %246 in 1 : vector<32x128xbf16>, vector<32x128xbf16>, vector<32x128xbf16>, vector<32x128xbf16>, vector<32x128xbf16>, vector<32x128xbf16>, vector<32x128xbf16>, vector<32x128xbf16>, vector<32x128xbf16> -> vector<32x1152xbf16>
    %c0_83 = arith.constant 0 : index
    %c0_84 = arith.constant 0 : index
    %248 = vector.load %arg5[%c0_83, %c0_84] : memref<1152x128xbf16, #tpu.memory_space<vmem>>, vector<1152x128xbf16>
    %cst_85 = arith.constant dense<0.000000e+00> : vector<32x128xf32>
    %249 = tpu.matmul %247, %248, %cst_85 {dimension_numbers = #tpu.dot_dimension_numbers<[1], [0], [0], [1], [0, 0, 1, 1], [], []>} : vector<32x1152xbf16>, vector<1152x128xbf16>, vector<32x128xf32> -> vector<32x128xf32>
    %c0_86 = arith.constant 0 : index
    %c0_87 = arith.constant 0 : index
    %250 = vector.load %arg6[%c0_86, %c0_87] : memref<1x128xf32, #tpu.memory_space<vmem>>, vector<1x128xf32>
    %251 = vector.broadcast %250 : vector<1x128xf32> to vector<32x128xf32>
    %252 = arith.addf %249, %251 : vector<32x128xf32>
    %cst_88 = arith.constant 0.000000e+00 : f32
    %253 = vector.broadcast %cst_88 : f32 to vector<32x128xf32>
    %254 = arith.maximumf %252, %253 : vector<32x128xf32>
    %255 = arith.truncf %254 : vector<32x128xf32> to vector<32x128xbf16>
    %c0_89 = arith.constant 0 : index
    %c0_90 = arith.constant 0 : index
    %256 = vector.load %arg7[%c0_89, %c0_90] : memref<128x128xbf16, #tpu.memory_space<vmem>>, vector<128x128xbf16>
    %cst_91 = arith.constant dense<0.000000e+00> : vector<32x128xf32>
    %257 = tpu.matmul %255, %256, %cst_91 {dimension_numbers = #tpu.dot_dimension_numbers<[1], [0], [0], [1], [0, 0, 1, 1], [], []>} : vector<32x128xbf16>, vector<128x128xbf16>, vector<32x128xf32> -> vector<32x128xf32>
    %258 = vector.extract_strided_slice %4 {offsets = [16, 0], sizes = [32, 128], strides = [1, 1]} : vector<64x128xf32> to vector<32x128xf32>
    %c0_92 = arith.constant 0 : index
    %c0_93 = arith.constant 0 : index
    %259 = vector.load %arg8[%c0_92, %c0_93] : memref<1x128xf32, #tpu.memory_space<vmem>>, vector<1x128xf32>
    %260 = vector.broadcast %259 : vector<1x128xf32> to vector<32x128xf32>
    %261 = arith.addf %257, %260 : vector<32x128xf32>
    %262 = arith.addf %261, %258 : vector<32x128xf32>
    %cst_94 = arith.constant 0.000000e+00 : f32
    %263 = vector.broadcast %cst_94 : f32 to vector<32x128xf32>
    %264 = arith.maximumf %262, %263 : vector<32x128xf32>
    %c0_95 = arith.constant 0 : index
    %c0_96 = arith.constant 0 : index
    %c0_97 = arith.constant 0 : index
    %265 = vector.load %arg9[%c0_95, %c0_96, %c0_97] : memref<1x32x128xf32, #tpu.memory_space<vmem>>, vector<1x32x128xf32>
    %266 = vector.shape_cast %265 : vector<1x32x128xf32> to vector<32x128xf32>
    %267 = vector.shape_cast %264 : vector<32x128xf32> to vector<1x32x128xf32>
    tpu.vector_store %arg9[%c0_95, %c0_96, %c0_97], %267 {strides = array<i32>} : memref<1x32x128xf32, #tpu.memory_space<vmem>>, vector<1x32x128xf32>,
    return
  }
  func.func @transform_0(%arg0: i32, %arg1: i32) -> (i32, i32, i32) {
    %c0_i32 = arith.constant 0 : i32
    %c0_i32_0 = arith.constant 0 : i32
    %c0_i32_1 = arith.constant 0 : i32
    return %arg0, %c0_i32, %c0_i32_0 : i32, i32, i32
  }
  func.func @transform_1(%arg0: i32, %arg1: i32) -> (i32, i32) {
    %c0_i32 = arith.constant 0 : i32
    %c0_i32_0 = arith.constant 0 : i32
    %c0_i32_1 = arith.constant 0 : i32
    return %c0_i32, %c0_i32_0 : i32, i32
  }
  func.func @transform_2(%arg0: i32, %arg1: i32) -> (i32, i32) {
    %c0_i32 = arith.constant 0 : i32
    %c0_i32_0 = arith.constant 0 : i32
    %c0_i32_1 = arith.constant 0 : i32
    return %c0_i32, %c0_i32_0 : i32, i32
  }
  func.func @transform_3(%arg0: i32, %arg1: i32) -> (i32, i32) {
    %c0_i32 = arith.constant 0 : i32
    %c0_i32_0 = arith.constant 0 : i32
    %c0_i32_1 = arith.constant 0 : i32
    return %c0_i32, %c0_i32_0 : i32, i32
  }
  func.func @transform_4(%arg0: i32, %arg1: i32) -> (i32, i32) {
    %c0_i32 = arith.constant 0 : i32
    %c0_i32_0 = arith.constant 0 : i32
    %c0_i32_1 = arith.constant 0 : i32
    return %c0_i32, %c0_i32_0 : i32, i32
  }
  func.func @transform_5(%arg0: i32, %arg1: i32) -> (i32, i32) {
    %c0_i32 = arith.constant 0 : i32
    %c0_i32_0 = arith.constant 0 : i32
    %c0_i32_1 = arith.constant 0 : i32
    return %c0_i32, %c0_i32_0 : i32, i32
  }
  func.func @transform_6(%arg0: i32, %arg1: i32) -> (i32, i32) {
    %c0_i32 = arith.constant 0 : i32
    %c0_i32_0 = arith.constant 0 : i32
    %c0_i32_1 = arith.constant 0 : i32
    return %c0_i32, %c0_i32_0 : i32, i32
  }
  func.func @transform_7(%arg0: i32, %arg1: i32) -> (i32, i32, i32) {
    %c0_i32 = arith.constant 0 : i32
    %c0_i32_0 = arith.constant 0 : i32
    return %arg0, %arg1, %c0_i32 : i32, i32, i32
  }
}

</mosaic_0001>

<bundles_post_ra>
// kernel: tpu_custom_call.1
= control target key start
LH: loop header
LB: loop body
LE: loop exit
PB: predicated region body
PF: predicated region fallthrough
CT: control target
= control target key end

     0   :  { %s4564_s0 = inlined_call_operand.hbm [shape: f32[8,96,128], index: 0, kind: input, shape index: {}]   ;;  %s4565_s1 = inlined_call_operand.hbm [shape: bf16[128,128], index: 1, kind: input, shape index: {}]   ;;  %s4566_s2 = inlined_call_operand.vmem [shape: f32[1,128], index: 2, kind: input, shape index: {}]   ;;  %s4567_s3 = inlined_call_operand.hbm [shape: bf16[1152,128], index: 3, kind: input, shape index: {}]   ;;  %s4568_s4 = inlined_call_operand.vmem [shape: f32[1,128], index: 4, kind: input, shape index: {}]   ;;  %s4569_s5 = inlined_call_operand.hbm [shape: bf16[128,128], index: 5, kind: input, shape index: {}]   ;;  %s4570_s6 = inlined_call_operand.vmem [shape: f32[1,128], index: 6, kind: input, shape index: {}]   ;;  %s4571_s7 = inlined_call_operand.hbm [shape: f32[8,64,128], index: 7, kind: output, shape index: {}]  }
   0x1   :  { %4630 = sst [smem:[#allocation21_spill]] %s4565_s1 }
   0x2   :  { %4631 = sst [smem:[#allocation22_spill]] %s4567_s3 }
   0x3   :  { %4632 = sst [smem:[#allocation23_spill]] %s4569_s5 }
   0x4   :  { %4633 = sst [smem:[#allocation24_spill]] %s4570_s6 }
   0x5   :  { %4634 = sst [smem:[#allocation25_spill]] %s4571_s7 }
   0x6   :  { %12 = vsyncpa [#allocation3], 0 }
   0x7   :  { %14 = vsyncpa [#allocation3 + $0x1], 0 }
   0x8   :  { %15 = vsyncpa [#allocation6], 0 }
   0x9   :  { %16 = vsyncpa [#allocation9], 0 }
   0xa   :  { %17 = vsyncpa [#allocation4], 0 }
   0xb   :  { %19 = vsyncpa [#allocation4 + $0x1], 0  ;;  %s3355_s24 = smov 0   ;;  %s3357_s25 = smov 0  }
   0xc   :  { %s3359_s26 = smov 0   ;;  %s3361_s27 = smov 0  }
   0xd   :  { %s3363_s28 = smov 0   ;;  %s3365_s29 = smov 0  }
   0xe   :  { %s3367_s30 = smov 0   ;;  %s3369_s8 = smov 0  }
   0xf   :  { %s3371_s9 = smov 0   ;;  %s3373_s10 = smov 0  }
  0x10   :  { %s3375_s11 = smov 0  }
  0x11 LB: > { %4635 = sst [smem:[#allocation15_spill]] %s3261_s24  ;;  %s2492_s12 = sadd.s32 4294967295, %s3301_s11   ;;  %s3301_s11 = sphi %s3375_s11, %s25_s11   ;;  %s3297_s10 = sphi %s3373_s10, %s4859_s10   ;;  %s3293_s9 = sphi %s3371_s9, %s4850_s9   ;;  %s3289_s8 = sphi %s3369_s8, %s4858_s8   ;;  %s3285_s30 = sphi %s3367_s30, %s4849_s30   ;;  %s3281_s29 = sphi %s3365_s29, %s4857_s29   ;;  %s3277_s28 = sphi %s3363_s28, %s4856_s28   ;;  %s3273_s27 = sphi %s3361_s27, %s4855_s27   ;;  %s3269_s26 = sphi %s3359_s26, %s4854_s26   ;;  %s3265_s25 = sphi %s3357_s25, %s4853_s25   ;;  %s3261_s24 = sphi %s3355_s24, %s4852_s24  }
  0x12   : > { %4636 = sst [smem:[#allocation16_spill]] %s3293_s9  ;;  %s2493_s13 = sadd.s32 4294967294, %s3301_s11  }
  0x13   : > { %p57_p0 = scmp.ne.s32.totalorder %s3277_s28, %s3273_s27  ;;  %p3411_p1 = scmp.eq.s32.totalorder %s2492_s12, 0 }
  0x14   : > { %p208_p2 = scmp.ne.s32.totalorder %s3269_s26, %s3265_s25  ;;  %p209_p4 = scmp.eq.s32.totalorder %s2492_s12, 15 }
  0x15   : > { %s4637_s14 = scalar_select %p3411_p1, 1, 0 }
  0x16   : > { %p3420_p3 = por %p3411_p1, %p57_p0  ;;  %p214_p5 = scmp.ne.s32.totalorder %s3265_s25, %s3261_s24 }
  0x17   : > { %p215_p6 = scmp.eq.s32.totalorder %s2493_s13, 15  ;;  %p3426_p7 = por %p209_p4, %p208_p2 }
  0x18   : > { %s4638_s16 = scalar_select %p3420_p3, 1, 0 }
  0x19   : > { %s4639_s17 = scalar_select %p3426_p7, 1, 0 }
  0x1a   : > { %p2494_p8 = scmp.ge.s32.totalorder %s3301_s11, 1  ;;  %p3431_p9 = por %p215_p6, %p214_p5 }
  0x1b   : > { %4640 = sst [smem:[#allocation17_spill]] %s4639_s17  ;;  %p222_p10 = scmp.lt.s32.totalorder %s3301_s11, 17 }
  0x1c   : > { %s4641_s18 = scalar_select %p3431_p9, 1, 0 }
  0x1d   : > { %p3436_p11 = pnand %p2494_p8, %p222_p10  ;;  %s3303_s20 = smov [#allocation5]  }
  0x1e   : > { %4642 = sst [smem:[#allocation18_spill]] %s4641_s18  ;;  %s234_s21 = sshll.u32 %s3303_s20, 4  ;;  %s235_s21 = int_to_ptr.vmem [resolvable:$true] %s234_s21 }
  0x1f   : > { %p2851_p12 = pneg %p3436_p11  ;;  %s3304_s23 = smov [#allocation7]  }
  0x20   : > { %s250_s27 = sshll.u32 %s3304_s23, 4  ;;  %s3305_s12 = smov [#allocation8]   ;;  %s251_s27 = int_to_ptr.vmem [resolvable:$true] %s250_s27 }
  0x21   : > { %p3444_p13 = pnand %p2851_p12, %p3411_p1  ;;  %s266_s13 = sshll.u32 %s3305_s12, 4  ;;  %s267_s13 = int_to_ptr.vmem [resolvable:$true] %s266_s13 }
  0x22   : > { %s3078_s15 = scalar_lea.vmem %s235_s21, 1024  ;;  %p3086_p6 = scmp.lt.s32.totalorder %s235_s21, %s235_s21 }
  0x23   : > { %p3069_p0 = pneg %p3444_p13  ;;  %p3079_p2 = scmp.ne.s32.totalorder %s235_s21, %s3078_s15 }
  0x24   : > { %p3087_p8 = scmp.lt.s32.totalorder %s3078_s15, %s3078_s15 }
  0x25   : > { %p3081_p4 = pnand %p3079_p2, %p3069_p0 }
  0x26   : > { %p3088_p10 = por %p3087_p8, %p3086_p6 }
  0x27   : > { %p3082_p5 = pneg %p3081_p4 }
  0x29   : > { %p3089_p12 = pnand %p3088_p10, %p3082_p5 }
  0x2b   : > { %3092 = shalt.err (!%p3089_p12)
}
  0x2c   : > { %s3306_s20 = smov 64   ;;  %s3307_s23 = smov 4  }
  0x2d   : > { %s4645_s1 = sld [smem:[#allocation21_spill]]  ;;  %s3104_s24 = scalar_lea.vmem %s251_s27, 9216 }
  0x2e   : > { %p3105_p9 = scmp.ne.s32.totalorder %s251_s27, %s3104_s24  ;;  %p3112_p7 = scmp.lt.s32.totalorder %s251_s27, %s251_s27 }
  0x2f   : > { %p3113_p1 = scmp.lt.s32.totalorder %s3104_s24, %s3104_s24 }
  0x30   : > { %p3107_p2 = pnand %p3105_p9, %p3069_p0 }
  0x31   : > { %p3114_p6 = por %p3113_p1, %p3112_p7 }
  0x32   : > { %p3108_p4 = pneg %p3107_p2 }
  0x33   : > { %2854 = dma.hbm_to_vmem [thread:$0]  (!%p3444_p13), %s4645_s1, 1024, %s235_s21, [#allocation6], %s3306_s20, %s3306_s20, %s3307_s23  }
  0x34   : > { %p3115_p5 = pnand %p3114_p6, %p3108_p4 }
  0x36   : > { %3118 = shalt.err (!%p3115_p5)
}
  0x37   : > { %s4646_s3 = sld [smem:[#allocation22_spill]]  ;;  %s3130_s18 = scalar_lea.vmem %s267_s13, 1024 }
  0x38   : > { %p3131_p8 = scmp.ne.s32.totalorder %s267_s13, %s3130_s18  ;;  %p3138_p12 = scmp.lt.s32.totalorder %s267_s13, %s267_s13 }
  0x39   : > { %p3139_p2 = scmp.lt.s32.totalorder %s3130_s18, %s3130_s18 }
  0x3a   : > { %p3133_p10 = pnand %p3131_p8, %p3069_p0 }
  0x3b   : > { %p3140_p3 = por %p3139_p2, %p3138_p12 }
  0x3c   : > { %p3134_p9 = pneg %p3133_p10 }
  0x3d   : > { %2857 = dma.hbm_to_vmem [thread:$0]  (!%p3444_p13), %s4646_s3, 9216, %s251_s27, [#allocation6], %s3306_s20, %s3306_s20, %s3307_s23  }
  0x3e   : > { %p3141_p1 = pnand %p3140_p3, %p3134_p9 }
  0x40   : > { %3144 = shalt.err (!%p3141_p1)
}
  0x41   : > { %s4647_s5 = sld [smem:[#allocation23_spill]]  ;;  %s34_s7 = sadd.s32 1, %s3293_s9 }
  0x42   : > { %p35_p3 = scmp.ge.s32.totalorder %s34_s7, 2  ;;  %s37_s27 = sadd.s32 1, %s3297_s10 }
  0x43   : > { %s44_s22 = sadd.s32 1, %s3281_s29  ;;  %p51_p7 = scmp.ne.s32.totalorder %s3281_s29, %s3277_s28 }
  0x44   : > { %s4861_s7 = smov (%p35_p3, %s34_s7), 0  ;;  %s4863_s27 = smov (!%p35_p3, %s37_s27), %s3297_s10 }
  0x45   : > { %4648 = sst [smem:[#allocation19_spill]] %s4861_s7  ;;  %p52_p0 = scmp.eq.s32.totalorder %s3301_s11, 0 }
  0x46   : > { %s194_s12 = ssub.s32 %s3293_s9, %s4861_s7  ;;  %p39_p4 = scmp.ge.s32.totalorder %s4863_s27, 8 }
  0x47   : > { %2860 = dma.hbm_to_vmem [thread:$0]  (!%p3444_p13), %s4647_s5, 1024, %s267_s13, [#allocation9], %s3306_s20, %s3306_s20, %s3307_s23  }
  0x48   : > { %p2872_p6 = scmp.lt.s32.totalorder %s3301_s11, 16  ;;  %p3486_p13 = por %p52_p0, %p51_p7 }
  0x49   : > { %s283_s20 = sand.u32 1, %s3281_s29   ;;  %s4865_s27 = smov (%p39_p4, %s4863_s27), 0 }
  0x4a   : > { %4650 = sst [smem:[#allocation20_spill]] %s4865_s27  ;;  %s2832_s23 = smul.u32 96, %s283_s20 }
  0x4b   : > { %s41_s15 = ssub.s32 %s3297_s10, %s4865_s27  ;;  %s2833_s18 = smul.u32 1536, %s3297_s10 }
  0x4c   : > { %p42_p5 = scmp.eq.s32.totalorder %s41_s15, 0  ;;  %s195_s24 = sor.u32 %s194_s12, %s41_s15 }
  0x4d   : > { %p196_p8 = scmp.eq.s32.totalorder %s195_s24, 0  ;;  %s4651_s1 = sadd.s32 1, %s3269_s26 }
  0x4e   : > { %s3497_s21 = scalar_select %p42_p5, %s3281_s29, %s44_s22  }
  0x4f   : > { %s3502_s3 = scalar_select %p196_p8, %s3269_s26, %s4651_s1  }
  0x50   : > { %s293_s9 = scalar_lea.hbm %s4564_s0, %s2833_s18  ;;  %s287_s17 = scalar_lea.vmem [#allocation2], %s2832_s23 }
  0x51   : > { %s294_s6 = sshll.u32 %s287_s17, 4  ;;  %p3511_p10 = pnand %p2872_p6, %p3486_p13  ;;  %s295_s6 = int_to_ptr.vmem [resolvable:$true] %s294_s6 }
  0x52   : > { %s284_s12 = scalar_lea.sflag [#allocation3], %s283_s20  ;;  %s3158_s22 = scalar_lea.vmem %s295_s6, 1536 }
  0x53   : > { %p3147_p9 = pneg %p3511_p10  ;;  %p3159_p12 = scmp.ne.s32.totalorder %s295_s6, %s3158_s22 }
  0x54   : > { %s3308_s1 = smov [#allocation2]  }
  0x55   : > { %p3161_p2 = pnand %p3159_p12, %p3147_p9  ;;  %s3163_s5 = sshll.u32 %s3308_s1, 4  ;;  %s3164_s5 = int_to_ptr.vmem [resolvable:$false] %s3163_s5 }
  0x56   : > { %s3165_s7 = scalar_lea.vmem %s3164_s5, 3072  ;;  %p3166_p3 = scmp.lt.s32.totalorder %s295_s6, %s3164_s5 }
  0x57   : > { %p3162_p1 = pneg %p3161_p2  ;;  %p3167_p7 = scmp.lt.s32.totalorder %s3165_s7, %s3158_s22 }
  0x59   : > { %p3168_p0 = por %p3167_p7, %p3166_p3 }
  0x5b   : > { %p3169_p4 = pnand %p3168_p0, %p3162_p1 }
  0x5d   : > { %3172 = shalt.err (!%p3169_p4)
}
  0x5e   : > { %s3309_s17 = smov 128   ;;  %s3310_s13 = smov 8  }
  0x5f   : > { %2864 = dma.hbm_to_vmem [thread:$0]  (!%p3511_p10), %s293_s9, 1536, %s295_s6, %s284_s12, %s3309_s17, %s3309_s17, %s3310_s13  }
  0x60   : > { %306 = sbr.rel (%p3436_p11) target bundleno = 864 (0x360), region = 48  ;;  %s308_s20 = sand.u32 (!%p3436_p11), 1, %s3277_s28  }
  0x61   : > { %s2834_s23 = smul.u32 (!%p3436_p11), 96, %s308_s20  ;;  %s309_s15 = scalar_lea.sflag (!%p3436_p11), [#allocation3], %s308_s20 }
  0x62   : > { %p4653_p6 = scmp.ne.s32.totalorder (!%p3436_p11), %s4638_s16, 0 }
  0x63   : > { %s312_s18 = scalar_lea.vmem (!%p3436_p11), [#allocation2], %s2834_s23 }
  0x65   : > { %3244 = dma.done.wait (%p4653_p6), %s309_s15, 1536  }
  0x66   : > { %3246 = vsyncadd (%p4653_p6), %s309_s15, 4294965760  ;;  %p4654_p13 = scmp.ne.s32.totalorder %s4637_s14, 0 }
  0x68   : > { %3248 = dma.done.wait (%p4654_p13), [#allocation6], 10240  }
  0x69   : > { %3250 = vsyncadd (%p4654_p13), [#allocation6], 4294957056 }
  0x6a   : > { %3252 = dma.done.wait (%p4654_p13), [#allocation9], 1024  }
  0x6b   : > { %3254 = vsyncadd (%p4654_p13), [#allocation9], 4294966272  ;;  %v2975_v0 = vld [vmem:[#allocation5 + $0x38] sm:$0xff]   ;;  %v2976_v1 = vld [vmem:[#allocation5 + $0x30] sm:$0xff]   ;;  %s2505_s6 = sshll.u32 %s3285_s30, 5  ;;  %v521_v54 = vlaneseq  ;;  %s2515_s14 = sshll.u32 %s3285_s30, 2 }
  0x6c   : > { %2768 = vmatprep.subr.bf16.mxu0 %v2975_v0  ;;  %v2977_v2 = vld [vmem:[#allocation5 + $0x28] sm:$0xff]   ;;  %s3535_s9 = scalar_lea.vmem %s312_s18, %s2505_s6 [#allocation2]  ;;  %v2978_v3 = vld [vmem:[#allocation5 + $0x20] sm:$0xff]   ;;  %v2979_v7 = vld [vmem:[#allocation5 + $0x18] sm:$0xff]   ;;  %v535_v61 = vstv %s2515_s14  ;;  %s352_s12 = sand.u32 1, %s3265_s25  }
  0x6d   : > { %2769 = vmatpush3.bf16.msra.mxu0 %v2975_v0  ;;  %v361_v4 = vld [vmem:[%s3535_s9] sm:$0xff]  ;;  %v362_v5 = vld [vmem:[%s3535_s9 + $0x8] sm:$0xff]  ;;  %v2980_v8 = vld [vmem:[#allocation5 + $0x10] sm:$0xff]   ;;  %v522_v55 = vshrl.u32 %v521_v54, 7  ;;  %s4842_s5 = sld [smem:[#allocation24_spill]]  ;;  %s2504_s7 = sshll.u32 %s352_s12, 5 }
  0x6e   : > { %2770 = vmatprep.subr.bf16.mxu0 %v2976_v1  ;;  %v369_v6 = vpack.c.bf16 %v362_v5, %v361_v4  ;;  %v2981_v9 = vld [vmem:[#allocation5 + $0x8] sm:$0xff]   ;;  %v2982_v10 = vld [vmem:[#allocation5] sm:$0xff]   ;;  %v363_v11 = vld [vmem:[%s3535_s9 + $0x10] sm:$0xff]  ;;  %s2620_s17 = sshll.u32 %s3289_s8, 3  ;;  %s354_s20 = scalar_lea.vmem [#allocation10], %s2504_s7 }
  0x6f   : > { %v364_v12 = vld [vmem:[%s3535_s9 + $0x18] sm:$0xff]  ;;  %v365_v13 = vld [vmem:[%s3535_s9 + $0x20] sm:$0xff]  ;;  %v366_v14 = vld [vmem:[%s3535_s9 + $0x28] sm:$0xff]  ;;  %v523_v56 = vadd.s32 8, %v522_v55  ;;  %v3545_v57 = vadd.s32 16, %v522_v55  ;;  %v3548_v58 = vadd.s32 24, %v522_v55  ;;  %s2371_s13 = sadd.s32 %s2620_s17, %s2515_s14 }
  0x70   : > { %2784 = vmatprep.mubr.bf16.mxu0 %v369_v6  ;;  %v370_v15 = vpack.c.bf16 %v364_v12, %v363_v11  ;;  %v371_v16 = vpack.c.bf16 %v366_v14, %v365_v13  ;;  %v367_v17 = vld [vmem:[%s3535_s9 + $0x30] sm:$0xff]  ;;  %v368_v18 = vld [vmem:[%s3535_s9 + $0x38] sm:$0xff]  ;;  %v2991_v28 = vld [vmem:[#allocation7 + $0xe8] sm:$0xff]   ;;  %v526_v59 = vshra.s32 %v522_v55, 3  ;;  %v530_v4 = vand.u32 7, %v522_v55  ;;  %s2374_s23 = sshll.u32 %s354_s20, 4  ;;  %s4495_s23 = int_to_ptr.vmem [resolvable:$true] %s2374_s23 }
  0x71   : > { %2771 = vmatpush3.bf16.msra.mxu0 %v2976_v1  ;;  %v372_v19 = vpack.c.bf16 %v368_v18, %v367_v17  ;;  %v2983_v20 = vld [vmem:[#allocation7 + $0xf8] sm:$0xff]   ;;  %v2987_v24 = vld [vmem:[#allocation7 + $0xf0] sm:$0xff]   ;;  %v2992_v29 = vld [vmem:[#allocation7 + $0xa8] sm:$0xff]   ;;  %v527_v60 = vshra.s32 %v523_v56, 3  ;;  %v528_v62 = vshra.s32 %v3545_v57, 3  ;;  %v529_v63 = vshra.s32 %v3548_v58, 3 }
  0x72   : > { %2772 = vmatprep.subr.bf16.mxu0 %v2977_v2  ;;  %v2984_v21 = vld [vmem:[#allocation7 + $0xb8] sm:$0xff]   ;;  %v2988_v25 = vld [vmem:[#allocation7 + $0xb0] sm:$0xff]   ;;  %v2993_v30 = vld [vmem:[#allocation7 + $0x68] sm:$0xff]   ;;  %v3554_v0 = vadd.s32 %v535_v61, %v526_v59  ;;  %v531_v6 = vand.u32 7, %v523_v56  ;;  %v3561_v11 = vadd.s32 1, %v530_v4  ;;  %v533_v12 = vand.u32 7, %v3548_v58 }
  0x73   : > { %v2985_v22 = vld [vmem:[#allocation7 + $0x78] sm:$0xff]   ;;  %v2989_v26 = vld [vmem:[#allocation7 + $0x70] sm:$0xff]   ;;  %v2994_v31 = vld [vmem:[#allocation7 + $0x28] sm:$0xff]   ;;  %v3556_v1 = vadd.s32 %v535_v61, %v527_v60  ;;  %v4659_v17 = vmov 0  ;;  %s4843_s15 = sld [smem:[#allocation17_spill]]  ;;  %s2621_s8 = sshll.u32 %s2371_s13, 7 }
  0x74   : > { %v2986_v23 = vld [vmem:[#allocation7 + $0x38] sm:$0xff]   ;;  %2636 = vmatprep.subr.bf16.mxu1 %v2985_v22  ;;  %v2990_v27 = vld [vmem:[#allocation7 + $0x30] sm:$0xff]   ;;  %v2995_v32 = vld [vmem:[#allocation7 + $0xe0] sm:$0xff]   ;;  %v540_v5 = vadd.s32 4294967295, %v3554_v0  ;;  %v3564_v13 = vadd.s32 1, %v531_v6  ;;  %vm4584_vm10 = vcmp.lt.s32.totalorder %v3561_v11, 8 }
  0x75   : > { %2773 = vmatpush3.bf16.msra.mxu0 %v2977_v2  ;;  %2637 = vmatpush3.bf16.msra.mxu1 %v2986_v23  ;;  %v2996_v33 = vld [vmem:[#allocation7 + $0xa0] sm:$0xff]   ;;  %v2999_v36 = vld [vmem:[#allocation7 + $0xd8] sm:$0xff]   ;;  %v3003_v40 = vld [vmem:[#allocation7 + $0xd0] sm:$0xff]   ;;  %v538_v2 = vadd.s32 %v535_v61, %v528_v62  ;;  %v670_v18 = vadd.s32 1, %v533_v12  ;;  %v4665_v23 = vmov 0  ;;  %v883_v60 = vadd.s32 1, %v3554_v0 }
  0x76   : > { %2774 = vmatprep.subr.bf16.mxu0 %v2978_v3  ;;  %2638 = vmatprep.subr.bf16.mxu1 %v2989_v26  ;;  %v2997_v34 = vld [vmem:[#allocation7 + $0x60] sm:$0xff]   ;;  %v3000_v37 = vld [vmem:[#allocation7 + $0x98] sm:$0xff]   ;;  %v3004_v41 = vld [vmem:[#allocation7 + $0x90] sm:$0xff]   ;;  %vm544_vm0 = vcmp.ge.s32.totalorder %v540_v5, 0  ;;  %vm548_vm1 = vcmp.lt.s32.totalorder %v540_v5, 8  ;;  %vm4585_vm12 = vcmp.lt.s32.totalorder %v3564_v13, 8 }
  0x77   : > { %v2998_v35 = vld [vmem:[#allocation7 + $0x20] sm:$0xff]   ;;  %v3001_v38 = vld [vmem:[#allocation7 + $0x58] sm:$0xff]   ;;  %v3005_v42 = vld [vmem:[#allocation7 + $0x50] sm:$0xff]   ;;  %v4671_v26 = vmov 0  ;;  %s4844_s6 = sld [smem:[#allocation25_spill]]  ;;  %s4504_s16 = scalar_lea.sflag [#allocation4], %s352_s12 }
  0x78   : > { %v3002_v39 = vld [vmem:[#allocation7 + $0x18] sm:$0xff]   ;;  %v3006_v43 = vld [vmem:[#allocation7 + $0x10] sm:$0xff]   ;;  %v3007_v44 = vld [vmem:[#allocation7 + $0xc8] sm:$0xff]   ;;  %s3173_s19 = scalar_lea.vmem %s4495_s23, 512 }
  0x79   : > { %2775 = vmatpush3.bf16.msra.mxu0 %v2978_v3  ;;  %2639 = vmatpush3.bf16.msra.mxu1 %v2990_v27  ;;  %v3008_v45 = vld [vmem:[#allocation7 + $0x88] sm:$0xff]   ;;  %v3011_v48 = vld [vmem:[#allocation7 + $0xc0] sm:$0xff]   ;;  %v3015_v52 = vld [vmem:[#allocation7 + $0x1f8] sm:$0xff]   ;;  %v539_v3 = vadd.s32 %v535_v61, %v529_v63  ;;  %v4673_v27 = vmov 0  ;;  %p3174_p11 = scmp.ne.s32.totalorder %s4495_s23, %s3173_s19  ;;  %p4845_p5 = scmp.ne.s32.totalorder %s4843_s15, 0 }
  0x7a   : > { %2776 = vmatprep.subr.bf16.mxu0 %v2979_v7  ;;  %2640 = vmatprep.subr.bf16.mxu1 %v2993_v30  ;;  %v3009_v46 = vld [vmem:[#allocation7 + $0x48] sm:$0xff]   ;;  %v3012_v49 = vld [vmem:[#allocation7 + $0x80] sm:$0xff]   ;;  %v3017_v53 = vld [vmem:[#allocation7 + $0x178] sm:$0xff]  }
  0x7b   : > { %v3010_v47 = vld [vmem:[#allocation7 + $0x8] sm:$0xff]   ;;  %v3013_v50 = vld [vmem:[#allocation7 + $0x40] sm:$0xff]   ;;  %vm3566_vm8 = vmand %vm544_vm0, %vm548_vm1  ;;  %vm733_vm0 = vcmp.ge.s32.totalorder %v3554_v0, 0  ;;  %vm737_vm1 = vcmp.lt.s32.totalorder %v3554_v0, 8  ;;  %p3175_p8 = pnand %p3174_p11, %p4845_p5 }
  0x7c   : > { %v3014_v51 = vld [vmem:[#allocation7] sm:$0xff]   ;;  %vm3592_vm15 = vmand %vm3566_vm8, %vm4584_vm10 }
  0x7d   : > { %2777 = vmatpush3.bf16.msra.mxu0 %v2979_v7  ;;  %2641 = vmatpush3.bf16.msra.mxu1 %v2994_v31  ;;  %v541_v7 = vadd.s32 4294967295, %v3556_v1  ;;  %vm3616_vm10 = vmand %vm733_vm0, %vm737_vm1  ;;  %v4679_v31 = vmov 0  ;;  %s4500_s14 = scalar_lea.hbm %s4844_s6, %s2621_s8  ;;  %p3176_p10 = pneg %p3175_p8 }
  0x7e   : > { %2778 = vmatprep.subr.bf16.mxu0 %v2980_v8  ;;  %2642 = vmatprep.subr.bf16.mxu1 %v2997_v34 }
  0x7f   : > { %vm545_vm2 = vcmp.ge.s32.totalorder %v541_v7, 0  ;;  %vm549_vm3 = vcmp.lt.s32.totalorder %v541_v7, 8 }
  0x80   : > { %vm3570_vm9 = vmand %vm545_vm2, %vm549_vm3  ;;  %vm734_vm3 = vcmp.ge.s32.totalorder %v3556_v1, 0 }
  0x81   : > { %2779 = vmatpush3.bf16.msra.mxu0 %v2980_v8  ;;  %2643 = vmatpush3.bf16.msra.mxu1 %v2998_v35  ;;  %v532_v8 = vand.u32 7, %v3545_v57  ;;  %vm3602_vm2 = vmand %vm3570_vm9, %vm4585_vm12  ;;  %v4688_v35 = vmov 0 }
  0x82   : > { %2780 = vmatprep.subr.bf16.mxu0 %v2981_v9  ;;  %2644 = vmatprep.subr.bf16.mxu1 %v3001_v38  ;;  %v4666_v23 = vsel %vm3602_vm2, 4294967295, %v4665_v23  ;;  %v559_v38 = vadd.s32 4294967295, %v533_v12 }
  0x83   : > { %v669_v14 = vadd.s32 1, %v532_v8 }
  0x85   : > { %2781 = vmatpush3.bf16.msra.mxu0 %v2981_v9  ;;  %2645 = vmatpush3.bf16.msra.mxu1 %v3002_v39  ;;  %v542_v9 = vadd.s32 4294967295, %v538_v2  ;;  %vm4590_vm14 = vcmp.lt.s32.totalorder %v669_v14, 8  ;;  %v4693_v39 = vmov 0 }
  0x86   : > { %2782 = vmatprep.subr.bf16.mxu0 %v2982_v10  ;;  %2646 = vmatprep.subr.bf16.mxu1 %v3005_v42  ;;  %v3311_v42 = vmov 0  }
  0x87   : > { %vm546_vm4 = vcmp.ge.s32.totalorder %v542_v9, 0  ;;  %vm550_vm5 = vcmp.lt.s32.totalorder %v542_v9, 8 }
  0x88   : > { %vm3575_vm11 = vmand %vm546_vm4, %vm550_vm5  ;;  %vm738_vm4 = vcmp.lt.s32.totalorder %v3556_v1, 8  ;;  %vm4593_vm5 = vcmp.lt.s32.totalorder %v670_v18, 8 }
  0x89   : > { %2783 = vmatpush3.bf16.msra.mxu0 %v2982_v10  ;;  %2647 = vmatpush3.bf16.msra.mxu1 %v3006_v43  ;;  %v543_v10 = vadd.s32 4294967295, %v539_v3  ;;  %v4660_v17 = vsel %vm3575_vm11, 4294967295, %v4659_v17 }
  0x8a   : > { %2664 = vmatprep.subr.bf16.mxu0 %v2983_v20  ;;  %2648 = vmatprep.subr.bf16.mxu1 %v3009_v46  ;;  %v3584_v20 = vadd.s32 4294967295, %v530_v4 }
  0x8b   : > { %vm547_vm6 = vcmp.ge.s32.totalorder %v543_v10, 0  ;;  %vm551_vm7 = vcmp.lt.s32.totalorder %v543_v10, 8 }
  0x8c   : > { %2785 = vmatmul.mubr.bf16.vlgmr.msra.gmra.mxu0 %v370_v15  ;;  %v4655_v15 = vmov 0  ;;  %vm3580_vm13 = vmand %vm547_vm6, %vm551_vm7  ;;  %vm4596_vm7 = vcmp.ge.s32.totalorder %v3584_v20, 0  ;;  %vm4686_vm1 = vcmp.ge.s32.totalorder %v3584_v20, 0 }
  0x8d   : > { %2788 = vmatprep.mubr.bf16.mxu0 %v371_v16  ;;  %2665 = vmatpush3.bf16.msra.mxu0 %v2984_v21  ;;  %v4656_v15 = vsel %vm3566_vm8, 4294967295, %v4655_v15  ;;  %v4657_v16 = vmov 0  ;;  %v3586_v21 = vadd.s32 4294967295, %v531_v6  ;;  %vm3611_vm6 = vmand %vm3575_vm11, %vm4590_vm14  ;;  %vm735_vm14 = vcmp.ge.s32.totalorder %v538_v2, 0 }
  0x8e   : > { %2666 = vmatprep.subr.bf16.mxu0 %v2987_v24  ;;  %2649 = vmatpush3.bf16.msra.mxu1 %v3010_v47  ;;  %v4658_v16 = vsel %vm3570_vm9, 4294967295, %v4657_v16  ;;  %v4667_v24 = vmov 0  ;;  %vm3621_vm9 = vmand %vm734_vm3, %vm738_vm4  ;;  %vm739_vm11 = vcmp.lt.s32.totalorder %v538_v2, 8  ;;  %vm736_vm4 = vcmp.ge.s32.totalorder %v539_v3, 0 }
  0x8f   : > { %2650 = vmatprep.subr.bf16.mxu1 %v3013_v50  ;;  %v4668_v24 = vsel %vm3611_vm6, 4294967295, %v4667_v24  ;;  %vm4599_vm12 = vcmp.ge.s32.totalorder %v3586_v21, 0  ;;  %v4672_v26 = vsel %vm3621_vm9, 4294967295, %v4671_v26  ;;  %vm3628_vm8 = vmand %vm3580_vm13, %vm4593_vm5  ;;  %vm740_vm5 = vcmp.lt.s32.totalorder %v539_v3, 8 }
  0x90   : > { %v4674_v27 = vsel %vm3628_vm8, 4294967295, %v4673_v27  ;;  %vm3642_vm3 = vmand %vm3616_vm10, %vm4596_vm7 }
  0x91   : > { %2667 = vmatpush3.bf16.msra.mxu0 %v2988_v25  ;;  %v4669_v25 = vmov 0  ;;  %vm3650_vm0 = vmand %vm3621_vm9, %vm4599_vm12 }
  0x92   : > { %2668 = vmatprep.subr.bf16.mxu0 %v2991_v28  ;;  %2651 = vmatpush3.bf16.msra.mxu1 %v3014_v51  ;;  %v4670_v25 = vsel %vm3616_vm10, 4294967295, %v4669_v25  ;;  %vm3661_vm7 = vmand %vm736_vm4, %vm740_vm5  ;;  %vm4683_vm10 = vcmp.lt.s32.totalorder %v669_v14, 8  ;;  %vm4690_vm5 = vcmp.lt.s32.totalorder %v670_v18, 8  ;;  %v4715_v51 = vmov 0 }
  0x93   : > { %2692 = vmatprep.subr.bf16.mxu1 %v3017_v53  ;;  %vm3683_vm4 = vmand %vm3661_vm7, %vm4690_vm5  ;;  %vm4702_vm5 = vcmp.lt.s32.totalorder %v669_v14, 8  ;;  %v4721_v53 = vmov 0 }
  0x94   : > { %2789 = vmatmul.mubr.bf16.gmra.mxu0 %v372_v19  ;;  %v4661_v19 = vmov 0 }
  0x95   : > { %2669 = vmatpush3.bf16.msra.mxu0 %v2992_v29  ;;  %v4662_v19 = vsel %vm3580_vm13, 4294967295, %v4661_v19  ;;  %v885_v29 = vadd.s32 1, %v538_v2  ;;  %vm3657_vm13 = vmand %vm735_vm14, %vm739_vm11  ;;  %vm4687_vm11 = vnez %v4656_v15  ;;  %v884_v2 = vadd.s32 1, %v3556_v1 }
  0x96   : > { %2670 = vmatprep.subr.bf16.mxu0 %v2995_v32  ;;  %v4680_v31 = vsel %vm3657_vm13, 4294967295, %v4679_v31  ;;  %v886_v32 = vadd.s32 1, %v539_v3  ;;  %vm3668_vm12 = vmand %vm3657_vm13, %vm4683_vm10  ;;  %vm4613_vm10 = vcmp.ge.s32.totalorder %v559_v38, 0 }
  0x97   : > { %vm889_vm9 = vcmp.ge.s32.totalorder %v885_v29, 0  ;;  %vm893_vm2 = vcmp.lt.s32.totalorder %v885_v29, 8  ;;  %vm3676_vm14 = vmand %vm4687_vm11, %vm4686_vm1  ;;  %vm4711_vm1 = vcmp.lt.s32.totalorder %v670_v18, 8 }
  0x98   : > { %v4689_v35 = vsel %vm3676_vm14, 4294967295, %v4688_v35  ;;  %vm890_vm13 = vcmp.ge.s32.totalorder %v886_v32, 0  ;;  %vm894_vm6 = vcmp.lt.s32.totalorder %v886_v32, 8  ;;  %vm3696_vm14 = vmand %vm889_vm9, %vm893_vm2 }
  0x99   : > { %2671 = vmatpush3.bf16.msra.mxu0 %v2996_v33  ;;  %v4681_v33 = vmov 0  ;;  %v4694_v39 = vsel %vm3696_vm14, 4294967295, %v4693_v39  ;;  %vm3706_vm8 = vmand %vm890_vm13, %vm894_vm6  ;;  %vm4700_vm13 = vnez %v4666_v23 }
  0x9a   : > { %2672 = vmatprep.subr.bf16.mxu0 %v2999_v36  ;;  %v4682_v33 = vsel %vm3661_vm7, 4294967295, %v4681_v33  ;;  %v558_v36 = vadd.s32 4294967295, %v532_v8  ;;  %vm4699_vm2 = vmpackc.low %vm3592_vm15, %vm3592_vm15 }
  0x9b   : > { %v699_v43 = vsel %vm4699_vm2, 65537, %v3311_v42  ;;  %vm4701_vm6 = vmpackc.low %vm4700_vm13, %vm4700_vm13  ;;  %vm4707_vm2 = vnez %v4668_v24 }
  0x9c   : > { %vm4621_vm7 = vcmp.ge.s32.totalorder %v558_v36, 0  ;;  %vm3732_vm11 = vmand %vm3696_vm14, %vm4702_vm5  ;;  %vm4709_vm5 = vnez %v4674_v27 }
  0x9d   : > { %2673 = vmatpush3.bf16.msra.mxu0 %v3000_v37  ;;  %v4691_v37 = vmov 0  ;;  %vm3713_vm9 = vmand %vm3696_vm14, %vm4621_vm7 }
  0x9e   : > { %2674 = vmatprep.subr.bf16.mxu0 %v3003_v40  ;;  %v4692_v37 = vsel %vm3683_vm4, 4294967295, %v4691_v37  ;;  %v4695_v40 = vmov 0  ;;  %vm3739_vm15 = vmand %vm3706_vm8, %vm4613_vm10  ;;  %vm4720_vm4 = vnez %v4682_v33 }
  0x9f   : > { %v4696_v40 = vsel %vm3706_vm8, 4294967295, %v4695_v40  ;;  %vm4708_vm13 = vmpackc.low %vm4707_vm2, %vm4707_vm2 }
  0xa0   : > { %v701_v47 = vsel %vm4708_vm13, 65537, %v3311_v42  ;;  %vm3758_vm10 = vmand %vm3706_vm8, %vm4711_vm1  ;;  %vm4714_vm13 = vnez %v4680_v31  ;;  %vm4718_vm1 = vnez %v4656_v15 }
  0xa1   : > { %2675 = vmatpush3.bf16.msra.mxu0 %v3004_v41  ;;  %vm3768_vm14 = vmand %vm4714_vm13, %vm4621_vm7 }
  0xa2   : > { %2676 = vmatprep.subr.bf16.mxu0 %v3007_v44  ;;  %v700_v44 = vsel %vm4701_vm6, 65537, %v3311_v42  ;;  %vm4710_vm6 = vmpackc.low %vm4709_vm5, %vm4709_vm5  ;;  %v4716_v51 = vsel %vm3768_vm14, 4294967295, %v4715_v51  ;;  %vm891_vm14 = vcmp.lt.s32.totalorder %v883_v60, 8 }
  0xa3   : > { %v2521_v50 = vcombine.low %v699_v43, %v700_v44  ;;  %vm4723_vm2 = vmpackc.low %vm3642_vm3, %vm3642_vm3  ;;  %vm4726_vm3 = vnez %v4692_v37 }
  0xa4   : > { %v765_v55 = vsel %vm4723_vm2, 65537, %v3311_v42  ;;  %vm4725_vm8 = vmpackc.low %vm3668_vm12, %vm3668_vm12  ;;  %vm4729_vm12 = vnez %v4658_v16 }
  0xa5   : > { %2677 = vmatpush3.bf16.msra.mxu0 %v3008_v45  ;;  %v4703_v45 = vmov 0  ;;  %v711_v54 = vshrl.u32 %v2521_v50, 16  ;;  %v714_v57 = vshll.u32 %v2521_v50, 16  ;;  %v853_v58 = vsel %vm4725_vm8, 65537, %v3311_v42  ;;  %vm4727_vm2 = vmpackc.low %vm4726_vm3, %vm4726_vm3 }
  0xa6   : > { %2678 = vmatprep.subr.bf16.mxu0 %v3011_v48  ;;  %v4704_v45 = vsel %vm3732_vm11, 4294967295, %v4703_v45  ;;  %v702_v48 = vsel %vm4710_vm6, 65537, %v3311_v42  ;;  %vm4719_vm11 = vcmp.ge.s32.totalorder %v559_v38, 0  ;;  %v854_v59 = vsel %vm4727_vm2, 65537, %v3311_v42 }
  0xa7   : > { %vm3784_vm7 = vmand %vm4720_vm4, %vm4719_vm11  ;;  %vm4732_vm3 = vcmp.ge.s32.totalorder %v558_v36, 0  ;;  %vm4733_vm2 = vnez %v4660_v17  ;;  %v2528_v0 = vcombine.low %v853_v58, %v854_v59  ;;  %vm4737_vm4 = vnez %v4662_v19 }
  0xa8   : > { %v4722_v53 = vsel %vm3784_vm7, 4294967295, %v4721_v53  ;;  %vm4724_vm11 = vmpackc.low %vm3650_vm0, %vm3650_vm0  ;;  %vm4736_vm0 = vcmp.ge.s32.totalorder %v559_v38, 0  ;;  %v713_v6 = vrot.slane %v711_v54, 3  ;;  %v716_v7 = vrot.slane %v714_v57, 4 }
  0xa9   : > { %2679 = vmatpush3.bf16.msra.mxu0 %v3012_v49  ;;  %v766_v56 = vsel %vm4724_vm11, 65537, %v3311_v42  ;;  %vm4728_vm11 = vcmp.ge.s32.totalorder %v3586_v21, 0  ;;  %vm3837_vm6 = vmand %vm4733_vm2, %vm4732_vm3  ;;  %vm4741_vm5 = vnez %v4704_v45  ;;  %v870_v14 = vshrl.u32 %v2528_v0, 16 }
  0xaa   : > { %2720 = vmatprep.subr.bf16.mxu0 %v3015_v52  ;;  %v2522_v52 = vcombine.low %v701_v47, %v702_v48  ;;  %vm3829_vm8 = vmand %vm4729_vm12, %vm4728_vm11  ;;  %v2523_v3 = vcombine.low %v765_v55, %v766_v56  ;;  %v3891_v23 = vor.u32 %v716_v7, %v713_v6  ;;  %v873_v44 = vshll.u32 %v2528_v0, 16 }
  0xab   : > { %vm3844_vm13 = vmand %vm4737_vm4, %vm4736_vm0  ;;  %vm892_vm0 = vcmp.lt.s32.totalorder %v884_v2, 8  ;;  %v3954_v43 = vrot.slane %v870_v14, 7 }
  0xac   : > { %v719_v61 = vshrl.u32 %v2522_v52, 16  ;;  %v722_v62 = vshll.u32 %v2522_v52, 16  ;;  %v777_v9 = vshll.u32 %v2523_v3, 16  ;;  %vm4742_vm11 = vmpackc.low %vm4741_vm5, %vm4741_vm5  ;;  %v780_v37 = vshrl.u32 %v2523_v3, 16 }
  0xad   : > { %v1011_v10 = vsel %vm4742_vm11, 65537, %v3311_v42  ;;  %vm4743_vm7 = vmpackc.low %vm3758_vm10, %vm3758_vm10  ;;  %vm4744_vm11 = vcmp.ge.s32.totalorder %v883_v60, 0  ;;  %v4010_v56 = vor.u32 %v873_v44, %v3954_v43 }
  0xae   : > { %v721_v1 = vrot.slane %v719_v61, 3  ;;  %v724_v8 = vrot.slane %v722_v62, 4  ;;  %v1012_v12 = vsel %vm4743_vm7, 65537, %v3311_v42  ;;  %vm3879_vm3 = vmand %vm4744_vm11, %vm891_vm14  ;;  %vm4749_vm14 = vnez %v4689_v35 }
  0xaf   : > { %vm4747_vm7 = vmpackc.low %vm4718_vm1, %vm4718_vm1  ;;  %vm4751_vm1 = vcmp.lt.s32.totalorder %v3561_v11, 8  ;;  %v2535_v29 = vcombine.low %v1011_v10, %v1012_v12  ;;  %v3938_v36 = vrot.slane %v777_v9, 1 }
  0xb0   : > { %v3889_v22 = vsel %vm4747_vm7, 65537, %v3311_v42  ;;  %vm4748_vm10 = vmpackc.low %vm3713_vm9, %vm3713_vm9  ;;  %vm4752_vm7 = vnez %v4670_v25  ;;  %v3936_v35 = vor.u32 %v724_v8, %v721_v1 }
  0xb1   : > { %v921_v24 = vsel %vm4748_vm10, 65537, %v3311_v42  ;;  %vm4750_vm11 = vmpackc.low %vm4749_vm14, %vm4749_vm14  ;;  %vm4757_vm10 = vnez %v4716_v51  ;;  %v1028_v50 = vshrl.u32 %v2535_v29, 16  ;;  %v1031_v51 = vshll.u32 %v2535_v29, 16 }
  0xb2   : > { %v588_v27 = vsel %vm4750_vm11, 65537, %v3311_v42  ;;  %vm3909_vm5 = vmand %vm4752_vm7, %vm4751_vm1  ;;  %vm4759_vm11 = vnez %v4722_v53  ;;  %v782_v55 = vor.u32 %v780_v37, %v3938_v36  ;;  %v4117_v37 = vld [vmem:[%s4566_s2] ss:$0 sm:$0xff] }
  0xb3   : > { %vm4755_vm4 = vmmov %vm3739_vm15  ;;  %vm4761_vm15 = vcmp.ge.s32.totalorder %v884_v2, 0  ;;  %v1030_v61 = vrot.slane %v1028_v50, 3  ;;  %v1033_v62 = vrot.slane %v1031_v51, 4 }
  0xb4   : > { %vm4756_vm9 = vmpackc.low %vm4755_vm4, %vm4755_vm4 }
  0xb5   : > { %v922_v28 = vsel %vm4756_vm9, 65537, %v3311_v42  ;;  %vm4758_vm14 = vmpackc.low %vm4757_vm10, %vm4757_vm10  ;;  %vm4765_vm9 = vcmp.lt.s32.totalorder %v3564_v13, 8  ;;  %vm4766_vm10 = vnez %v4672_v26 }
  0xb6   : > { %v767_v30 = vsel %vm4758_vm14, 65537, %v3311_v42  ;;  %vm4760_vm1 = vmpackc.low %vm4759_vm11, %vm4759_vm11  ;;  %vm4629_vm11 = vsmask.f32 4352  ;;  %v2530_v47 = vcombine.low %v921_v24, %v922_v28 }
  0xb7   : > { %v768_v32 = vsel %vm4760_vm1, 65537, %v3311_v42  ;;  %vm3932_vm2 = vmand %vm4761_vm15, %vm892_vm0  ;;  %vm4778_vm1 = vnez %v4696_v40 }
  0xb8   : > { %vm4764_vm4 = vmpackc.low %vm3829_vm8, %vm3829_vm8  ;;  %v3974_v48 = vcombine.low %v767_v30, %v768_v32  ;;  %v938_v59 = vshrl.u32 %v2530_v47, 16  ;;  %v941_v60 = vshll.u32 %v2530_v47, 16 }
  0xb9   : > { %v589_v38 = vsel %vm4764_vm4, 65537, %v3311_v42  ;;  %vm3950_vm15 = vmand %vm4766_vm10, %vm4765_vm9  ;;  %vm4774_vm9 = vcmp.ge.s32.totalorder %v3586_v21, 0  ;;  %v4006_v21 = vsel %vm4629_vm11, %v3891_v23, %v3936_v35 }
  0xba   : > { %vm4769_vm0 = vmpackc.low %vm3837_vm6, %vm3837_vm6  ;;  %vm4771_vm6 = vcmp.ge.s32.totalorder %v3584_v20, 0  ;;  %v2516_v52 = vcombine.low %v588_v27, %v589_v38  ;;  %v2518_v20 = vcombine.low %v3889_v22, %v3889_v22  ;;  %v784_v58 = vshll.u32 %v3974_v48, 16 }
  0xbb   : > { %v590_v45 = vsel %vm4769_vm0, 65537, %v3311_v42  ;;  %vm4770_vm8 = vmpackc.low %vm3844_vm13, %vm3844_vm13  ;;  %v940_v8 = vrot.slane %v938_v59, 4  ;;  %v943_v9 = vrot.slane %v941_v60, 5  ;;  %v788_v29 = vshrl.u32 %v3974_v48, 16 }
  0xbc   : > { %v591_v46 = vsel %vm4770_vm8, 65537, %v3311_v42  ;;  %vm3980_vm4 = vmand %vm3879_vm3, %vm4771_vm6  ;;  %v600_v63 = vshrl.u32 %v2516_v52, 16  ;;  %v603_v2 = vshll.u32 %v2516_v52, 16  ;;  %vm4784_vm6 = vcmp.lt.s32.totalorder %v3561_v11, 8 }
  0xbd   : > { %vm3991_vm0 = vmand %vm3932_vm2, %vm4774_vm9  ;;  %v2517_v54 = vcombine.low %v590_v45, %v591_v46  ;;  %vm4780_vm9 = vnez %v4662_v19  ;;  %vm598_vm8 = vsmask.f32 3328  ;;  %v786_v1 = vrot.slane %v784_v58, 1 }
  0xbe   : > { %vm4779_vm13 = vmpackc.low %vm4778_vm1, %vm4778_vm1  ;;  %v602_v14 = vrot.slane %v600_v63, 4  ;;  %v605_v22 = vrot.slane %v603_v2, 5  ;;  %v4103_v19 = vor.u32 %v1033_v62, %v1030_v61  ;;  %v4127_v25 = vor.u32 %v943_v9, %v940_v8 }
  0xbf   : > { %v4021_v57 = vsel %vm4779_vm13, 65537, %v3311_v42  ;;  %vm4781_vm1 = vmpackc.low %vm4729_vm12, %vm4729_vm12  ;;  %vm4782_vm13 = vnez %v4660_v17  ;;  %v608_v4 = vshrl.u32 %v2517_v54, 16  ;;  %v611_v0 = vshll.u32 %v2517_v54, 16 }
  0xc0   : > { %v651_v40 = vsel %vm4781_vm1, 65537, %v3311_v42  ;;  %vm4783_vm11 = vmpackc.low %vm4782_vm13, %vm4782_vm13  ;;  %vm4787_vm12 = vcmp.lt.s32.totalorder %v3564_v13, 8  ;;  %v2533_v7 = vcombine.low %v4021_v57, %v4021_v57  ;;  %v4179_v49 = vor.u32 %v605_v22, %v602_v14 }
  0xc1   : > { %v652_v3 = vsel %vm4783_vm11, 65537, %v3311_v42  ;;  %vm4046_vm14 = vmand %vm3879_vm3, %vm4784_vm6  ;;  %v610_v24 = vrot.slane %v608_v4, 4  ;;  %v613_v27 = vrot.slane %v611_v0, 5 }
  0xc2   : > { %vm4054_vm1 = vmand %vm3932_vm2, %vm4787_vm12  ;;  %vm4794_vm12 = vnez %v4682_v33  ;;  %v2519_v12 = vcombine.low %v651_v40, %v652_v3 }
  0xc3   : > { %vm4790_vm11 = vmpackc.low %vm3909_vm5, %vm3909_vm5  ;;  %v4181_v50 = vor.u32 %v613_v27, %v610_v24 }
  0xc4   : > { %v851_v11 = vsel %vm4790_vm11, 65537, %v3311_v42  ;;  %vm4791_vm6 = vmpackc.low %vm3950_vm15, %vm3950_vm15 }
  0xc5   : > { %v852_v13 = vsel %vm4791_vm6, 65537, %v3311_v42  ;;  %vm4792_vm13 = vmpackc.low %vm3980_vm4, %vm3980_vm4  ;;  %v4219_v34 = vsel %vm598_vm8, %v4179_v49, %v4181_v50 }
  0xc6   : > { %v919_v17 = vsel %vm4792_vm13, 65537, %v3311_v42  ;;  %vm4793_vm5 = vmpackc.low %vm3991_vm0, %vm3991_vm0  ;;  %v4098_v15 = vcombine.low %v851_v11, %v852_v13  ;;  %vm4797_vm13 = vsmask.f32 7424 }
  0xc7   : > { %v920_v6 = vsel %vm4793_vm5, 65537, %v3311_v42  ;;  %vm816_vm11 = vmpackc.low %vm4794_vm12, %vm4794_vm12  ;;  %v4120_v38 = vsel %vm4797_vm13, %v782_v55, %v786_v1  ;;  %vm4801_vm13 = vnez %v4680_v31  ;;  %vm727_vm12 = vcmp.ne.s16.totalorder %v3891_v23, 0 }
  0xc8   : > { %vm4795_vm15 = vmpackc.low %vm4780_vm9, %vm4780_vm9  ;;  %v2529_v28 = vcombine.low %v919_v17, %v920_v6  ;;  %v4158_v26 = vsel %vm816_vm11, 65537, %v3311_v42  ;;  %vm728_vm11 = vcmp.ne.s16.totalorder %v4006_v21, 0  ;;  %v863_v51 = vshrl.u32 %v4098_v15, 16 }
  0xc9   : > { %v4093_v10 = vsel %vm4795_vm15, 65537, %v3311_v42  ;;  %vm1005_vm4 = vmpackc.low %vm4046_vm14, %vm4046_vm14  ;;  %vm4137_vm15 = vcmp.ne.s16.totalorder %v2519_v12, 0  ;;  %vm4805_vm14 = vnez %v4694_v39  ;;  %v866_v3 = vshll.u32 %v4098_v15, 16 }
  0xca   : > { %vm1006_vm0 = vmpackc.low %vm4054_vm1, %vm4054_vm1  ;;  %v2520_v41 = vcombine.low %v4093_v10, %v4093_v10  ;;  %v1009_v47 = vsel %vm1005_vm4, 65537, %v3311_v42  ;;  %v930_v52 = vshrl.u32 %v2529_v28, 16  ;;  %v933_v54 = vshll.u32 %v2529_v28, 16 }
  0xcb   : > { %vm4796_vm6 = vmpackc.low %vm4752_vm7, %vm4752_vm7  ;;  %v1010_v31 = vsel %vm1006_vm0, 65537, %v3311_v42  ;;  %vm792_vm4 = vcmp.ne.s16.totalorder %v4120_v38, 0  ;;  %vm1077_vm0 = vcmask 1043456   ;;  %v865_v40 = vrot.slane %v863_v51, 7 }
  0xcc   : > { %v4112_v30 = vsel %vm4796_vm6, 65537, %v3311_v42  ;;  %vm968_vm5 = vmpackc.low %vm3879_vm3, %vm3879_vm3  ;;  %v2534_v60 = vcombine.low %v1009_v47, %v1010_v31  ;;  %v932_v4 = vrot.slane %v930_v52, 4  ;;  %vm4233_vm3 = vcmp.ne.s16.totalorder %v2533_v7, 0 }
  0xcd   : > { %vm4798_vm7 = vmpackc.low %vm4766_vm10, %vm4766_vm10  ;;  %vm4172_vm10 = vcmp.ne.s16.totalorder %v2518_v20, 0  ;;  %v4188_v20 = vor.u32 %v788_v29, %v786_v1  ;;  %v4199_v39 = vsel %vm968_vm5, 65537, %v3311_v42  ;;  %v4240_v27 = vor.u32 %v866_v3, %v865_v40 }
  0xce   : > { %v4135_v44 = vsel %vm4798_vm7, 65537, %v3311_v42  ;;  %vm969_vm6 = vmpackc.low %vm3932_vm2, %vm3932_vm2  ;;  %vm1068_vm2 = vcmask 1046528   ;;  %v2531_v13 = vcombine.low %v4199_v39, %v4199_v39  ;;  %v1020_v6 = vshrl.u32 %v2534_v60, 16 }
  0xcf   : > { %vm4802_vm9 = vmpackc.low %vm4801_vm13, %vm4801_vm13  ;;  %v2525_v55 = vcombine.low %v4112_v30, %v4135_v44  ;;  %v4207_v59 = vsel %vm969_vm6, 65537, %v3311_v42  ;;  %v1023_v1 = vshll.u32 %v2534_v60, 16  ;;  %vm793_vm5 = vcmp.ne.s16.totalorder %v4188_v20, 0 }
  0xd0   : > { %v4150_v46 = vsel %vm4802_vm9, 65537, %v3311_v42  ;;  %vm791_vm9 = vcmp.ne.s16.totalorder %v3938_v36, 0  ;;  %vm970_vm1 = vmpackc.low %vm4805_vm14, %vm4805_vm14  ;;  %vm616_vm7 = vcmp.ne.s16.totalorder %v4179_v49, 0  ;;  %vm617_vm6 = vcmp.ne.s16.totalorder %v4219_v34, 0 }
  0xd1   : > { %v4212_v63 = vsel %vm970_vm1, 65537, %v3311_v42  ;;  %v2526_v18 = vcombine.low %v4150_v46, %v4158_v26  ;;  %v935_v42 = vrot.slane %v933_v54, 5  ;;  %vm4808_vm13 = vsmask.f32 256 }
  0xd2   : > { %v2532_v17 = vcombine.low %v4207_v59, %v4212_v63  ;;  %v4244_v15 = vsel %vm4808_vm13, %v865_v40, %v4010_v56  ;;  %vm729_vm14 = vcmp.ne.s16.totalorder %v3936_v35, 0  ;;  %v1025_v56 = vrot.slane %v1023_v1, 4 }
  0xd3   : > { %v4250_v7 = vor.u32 %v935_v42, %v932_v4  ;;  %vm4268_vm1 = vcmp.ne.s16.totalorder %v2520_v41, 0  ;;  %vm1103_vm13 = vcmask 1042432  }
 0x14c   : > { %v2786_v32 = vpop.f32.mrf.mxu0 }
 0x14d   : > { %v487_v53 = vadd.f32 %v2786_v32, %v4117_v37 }
 0x14e   : > { %v478_v48 = vpop.f32.mrf.mxu0 }
 0x14f   : > { %v479_v61 = vadd.f32 %v4117_v37, %v478_v48  ;;  %v511_v0 = vmax.f32 %v487_v53, 0.0  ;;  %v1022_v48 = vrot.slane %v1020_v6, 3 }
 0x150   : > { %v2787_v58 = vpop.f32.mrf.mxu0 }
 0x151   : > { %v490_v62 = vadd.f32 %v2787_v58, %v4117_v37  ;;  %v509_v8 = vmax.f32 %v479_v61, 0.0 }
 0x152   : > { %v481_v2 = vpop.f32.mrf.mxu0 }
 0x153   : > { %v512_v5 = vmax.f32 %v490_v62, 0.0  ;;  %v482_v16 = vadd.f32 %v4117_v37, %v481_v2 }
 0x154   : > { %v2790_v11 = vpop.f32.mrf.mxu0 }
 0x155   : > { %v4227_v9 = vpack.c.bf16 %v512_v5, %v511_v0  ;;  %v510_v12 = vmax.f32 %v482_v16, 0.0  ;;  %v503_v14 = vadd.f32 %v2790_v11, %v4117_v37 }
 0x156   : > { %v494_v22 = vpop.f32.mrf.mxu0 }
 0x157   : > { %v517_v28 = vpack.c.bf16 %v510_v12, %v509_v8  ;;  %v495_v29 = vadd.f32 %v4117_v37, %v494_v22  ;;  %v795_v57 = vsel %vm792_vm4, %v4227_v9, 0  ;;  %v515_v32 = vmax.f32 %v503_v14, 0.0 }
 0x158   : > { %v2791_v47 = vpop.f32.mrf.mxu0  ;;  %v665_v31 = vsel %vm4137_vm15, %v4227_v9, 0  ;;  %v731_v53 = vsel %vm728_vm11, %v4227_v9, 0  ;;  %v1079_v23 = vrot.slane %v795_v57, 4  ;;  %v4287_v57 = vsel %vm598_vm8, %v4250_v7, %v4127_v25 }
 0x159   : > { %v664_v51 = vsel %vm4172_vm10, %v517_v28, 0  ;;  %v730_v52 = vsel %vm727_vm12, %v517_v28, 0  ;;  %v794_v38 = vsel %vm791_vm9, %v517_v28, 0  ;;  %v513_v61 = vmax.f32 %v495_v29, 0.0 }
 0x15a   : > { %v1045_v54 = vshll.u32 %v664_v51, 16  ;;  %v1069_v33 = vrot.slane %v730_v52, 1  ;;  %v1078_v58 = vrot.slane %v794_v38, 4  ;;  %v497_v60 = vpop.f32.mrf.mxu0  ;;  %v506_v36 = vadd.f32 %v2791_v47, %v4117_v37 }
 0x15b   : > { %v498_v62 = vadd.f32 %v4117_v37, %v497_v60  ;;  %v1050_v2 = vshll.u32 %v665_v31, 16  ;;  %v1043_v21 = vshrl.u32 %v664_v51, 16  ;;  %v1070_v10 = vrot.slane %v731_v53, 1 }
 0x15c   : > { %v1047_v40 = vrot.slane %v1045_v54, 1  ;;  %v1080_v3 = vsel %vm1077_vm0, %v1078_v58, %v1079_v23  ;;  %v516_v41 = vmax.f32 %v506_v36, 0.0  ;;  %v4278_v6 = vsel %vm616_vm7, %v517_v28, 0 }
 0x15d   : > { %v514_v4 = vmax.f32 %v498_v62, 0.0  ;;  %v1343_v0 = vshrl.u32 %v1080_v3, 16  ;;  %v1346_v5 = vshll.u32 %v1080_v3, 16  ;;  %v1071_v16 = vsel %vm1068_vm2, %v1069_v33, %v1070_v10 }
 0x15e   : > { %v1048_v42 = vor.u32 %v1047_v40, %v1043_v21  ;;  %v1052_v11 = vrot.slane %v1050_v2, 1  ;;  %v4280_v1 = vpack.c.bf16 %v516_v41, %v515_v32  ;;  %v1326_v14 = vshrl.u32 %v1071_v16, 16 }
 0x15f   : > { %v4282_v37 = vpack.c.bf16 %v514_v4, %v513_v61  ;;  %v1345_v8 = vrot.slane %v1343_v0, 3  ;;  %v1348_v12 = vrot.slane %v1346_v5, 4  ;;  %v1329_v22 = vshll.u32 %v1071_v16, 16 }
 0x160   : > { %v1054_v29 = vshrl.u32 %v665_v31, 16  ;;  %v4292_v49 = vsel %vm4233_vm3, %v4280_v1, 0  ;;  %v4300_v32 = vsel %vm617_vm6, %v4227_v9, 0  ;;  %v4302_v47 = vor.u32 %v1025_v56, %v1022_v48 }
 0x161   : > { %v796_v28 = vsel %vm793_vm5, %v4282_v37, 0  ;;  %v1125_v31 = vshll.u32 %v4292_v49, 16  ;;  %vm4811_vm15 = vsmask.f32 7424  ;;  %v1292_v24 = vshrl.u32 %v4278_v6, 16 }
 0x162   : > { %v1053_v51 = vsel %vm4811_vm15, %v1048_v42, %v1052_v11  ;;  %v1056_v52 = vor.u32 %v1054_v29, %v1052_v11  ;;  %v1081_v38 = vrot.slane %v796_v28, 4  ;;  %v1349_v53 = vor.u32 %v1348_v12, %v1345_v8  ;;  %vm4816_vm11 = vmmov %vm4811_vm15 }
 0x163   : > { %v732_v20 = vsel %vm729_vm14, %v4282_v37, 0  ;;  %v1328_v54 = vrot.slane %v1326_v14, 3  ;;  %v4310_v33 = vrot.slane %v1125_v31, 1  ;;  %v1331_v48 = vrot.slane %v1329_v22, 4  ;;  %v3016_v14 = vld [vmem:[#allocation7 + $0x1b8] sm:$0xff]  }
 0x164   : > { %v4312_v34 = vrot.slane %v732_v20, 1  ;;  %v666_v56 = vsel %vm4268_vm1, %v4282_v37, 0  ;;  %v1082_v58 = vsel %vm1077_vm0, %v1079_v23, %v1081_v38  ;;  %v1309_v61 = vshrl.u32 %v1053_v51, 16  ;;  %v3019_v20 = vld [vmem:[#allocation7 + $0x1f0] sm:$0xff]  }
 0x165   : > { %v1058_v60 = vshll.u32 %v666_v56, 16  ;;  %v1312_v36 = vshll.u32 %v1053_v51, 16  ;;  %v1351_v62 = vshrl.u32 %v1082_v58, 16  ;;  %v1354_v2 = vshll.u32 %v1082_v58, 16 }
 0x166   : > { %v1073_v35 = vsel %vm1068_vm2, %v1070_v10, %v4312_v34  ;;  %v1332_v21 = vor.u32 %v1331_v48, %v1328_v54  ;;  %vm4323_vm10 = vcmp.ne.s16.totalorder %v2531_v13, 0  ;;  %vm4330_vm12 = vcmp.ne.s16.totalorder %v2532_v17, 0 }
 0x167   : > { %v1334_v23 = vshrl.u32 %v1073_v35, 16  ;;  %v1337_v3 = vshll.u32 %v1073_v35, 16  ;;  %v1060_v41 = vrot.slane %v1058_v60, 1  ;;  %v1311_v4 = vrot.slane %v1309_v61, 3  ;;  %v3020_v35 = vld [vmem:[#allocation7 + $0x1b0] sm:$0xff]  }
 0x168   : > { %v1353_v10 = vrot.slane %v1351_v62, 3  ;;  %v1356_v0 = vrot.slane %v1354_v2, 4  ;;  %v1314_v5 = vrot.slane %v1312_v36, 4  ;;  %v1472_v16 = vshrl.u32 %v1081_v38, 16 }
 0x169   : > { %v1336_v39 = vrot.slane %v1334_v23, 3  ;;  %v1339_v13 = vrot.slane %v1337_v3, 4  ;;  %v1061_v42 = vsel %vm4816_vm11, %v1056_v52, %v1060_v41  ;;  %v1475_v11 = vshll.u32 %v1081_v38, 16 }
 0x16a   : > { %vm618_vm9 = vcmp.ne.s16.totalorder %v4181_v50, 0  ;;  %v1357_v59 = vor.u32 %v1356_v0, %v1353_v10  ;;  %v1315_v63 = vor.u32 %v1314_v5, %v1311_v4  ;;  %v1317_v17 = vshrl.u32 %v1061_v42, 16  ;;  %v3023_v4 = vld [vmem:[#allocation7 + $0x1e8] sm:$0xff]   ;;  %v3018_v0 = vld [vmem:[#allocation7 + $0x138] sm:$0xff]  }
 0x16b   : > { %v1320_v8 = vshll.u32 %v1061_v42, 16  ;;  %v4336_v12 = vor.u32 %v1339_v13, %v1336_v39  ;;  %v1474_v22 = vrot.slane %v1472_v16, 3  ;;  %v1477_v29 = vrot.slane %v1475_v11, 4  ;;  %v3021_v42 = vld [vmem:[#allocation7 + $0x170] sm:$0xff]  }
 0x16c   : > { %v1294_v28 = vrot.slane %v1292_v24, 3  ;;  %vm877_vm4 = vcmp.ne.s16.totalorder %v4240_v27, 0  ;;  %vm878_vm0 = vcmp.ne.s16.totalorder %v4244_v15, 0  ;;  %vm4817_vm3 = vsmask.f32 4352  ;;  %v3031_v15 = vld [vmem:[#allocation7 + $0x1d8] sm:$0xff]  }
 0x16d   : > { %v1358_v31 = vsel %vm4817_vm3, %v1349_v53, %v1357_v59  ;;  %v1319_v51 = vrot.slane %v1317_v17, 3  ;;  %v1322_v52 = vrot.slane %v1320_v8, 4  ;;  %v1295_v38 = vshll.u32 %v4278_v6, 16  ;;  %vm4818_vm5 = vmmov %vm4817_vm3  ;;  %v3024_v17 = vld [vmem:[#allocation7 + $0x1a8] sm:$0xff]  }
 0x16e   : > { %2056 = vmatprep.mubr.bf16.mxu0 %v1358_v31  ;;  %v1341_v54 = vsel %vm4818_vm5, %v1332_v21, %v4336_v12  ;;  %v1478_v48 = vor.u32 %v1477_v29, %v1474_v22  ;;  %v1300_v58 = vshrl.u32 %v4300_v32, 16  ;;  %v1303_v24 = vshll.u32 %v4300_v32, 16  ;;  %vm4819_vm6 = vmmov %vm4817_vm3  ;;  %v3022_v31 = vld [vmem:[#allocation7 + $0x130] sm:$0xff]  }
 0x16f   : > { %vm946_vm7 = vcmp.ne.s16.totalorder %v4250_v7, 0  ;;  %2057 = vmatmul.mubr.bf16.vlgmr.msra.gmra.mxu0 %v1341_v54  ;;  %v4347_v60 = vor.u32 %v1322_v52, %v1319_v51  ;;  %v1297_v53 = vrot.slane %v1295_v38, 4  ;;  %v1062_v61 = vshrl.u32 %v666_v56, 16  ;;  %vm4820_vm14 = vmmov %vm4817_vm3  ;;  %v3029_v7 = vld [vmem:[#allocation7 + $0x160] sm:$0xff]  }
 0x170   : > { %v1463_v36 = vshrl.u32 %v4312_v34, 16  ;;  %2721 = vmatpush3.bf16.msra.mxu0 %v3016_v14  ;;  %v1479_v6 = vsel %vm4819_vm6, %v1357_v59, %v1478_v48  ;;  %v1302_v62 = vrot.slane %v1300_v58, 3  ;;  %v1305_v2 = vrot.slane %v1303_v24, 4  ;;  %vm4821_vm15 = vmmov %vm4817_vm3  ;;  %v3025_v48 = vld [vmem:[#allocation7 + $0x168] sm:$0xff]  }
 0x171   : > { %v1466_v21 = vshll.u32 %v4312_v34, 16  ;;  %v1324_v32 = vsel %vm4820_vm14, %v1315_v63, %v4347_v60  ;;  %2064 = vmatprep.mubr.bf16.mxu0 %v1479_v6  ;;  %v1298_v23 = vor.u32 %v1297_v53, %v1294_v28  ;;  %v1064_v3 = vor.u32 %v1062_v61, %v1060_v41  ;;  %2722 = vmatprep.subr.bf16.mxu0 %v3019_v20  ;;  %v3027_v28 = vld [vmem:[#allocation7 + $0x1e0] sm:$0xff]  }
 0x172   : > { %v1465_v56 = vrot.slane %v1463_v36, 3  ;;  %2007 = vmatprep.mubr.bf16.mxu1 %v1324_v32  ;;  %v4354_v10 = vor.u32 %v1305_v2, %v1302_v62  ;;  %v986_v16 = vsel %vm4323_vm10, %v4227_v9, 0  ;;  %v987_v34 = vsel %vm4330_vm12, %v4282_v37, 0  ;;  %vm4822_vm12 = vmmov %vm4817_vm3  ;;  %v3028_v62 = vld [vmem:[#allocation7 + $0x1a0] sm:$0xff]  }
 0x173   : > { %v1468_v5 = vrot.slane %v1466_v21, 4  ;;  %v1454_v39 = vshrl.u32 %v1064_v3, 16  ;;  %v1457_v13 = vshll.u32 %v1064_v3, 16  ;;  %v1110_v41 = vshrl.u32 %v986_v16, 16 }
 0x174   : > { %v1112_v11 = vshll.u32 %v986_v16, 16  ;;  %vm947_vm1 = vcmp.ne.s16.totalorder %v4287_v57, 0  ;;  %v1307_v59 = vsel %vm4821_vm15, %v1298_v23, %v4354_v10  ;;  %2723 = vmatpush3.bf16.msra.mxu0 %v3020_v35  ;;  %v1117_v8 = vshll.u32 %v987_v34, 16  ;;  %v3032_v16 = vld [vmem:[#allocation7 + $0x198] sm:$0xff]  }
 0x175   : > { %v1469_v63 = vor.u32 %v1468_v5, %v1465_v56  ;;  %v1121_v40 = vshrl.u32 %v987_v34, 16  ;;  %vm879_vm10 = vcmp.ne.s16.totalorder %v3954_v43, 0  ;;  %2008 = vmatmul.mubr.bf16.vlgmr.msra.gmra.mxu1 %v1307_v59  ;;  %v1456_v45 = vrot.slane %v1454_v39, 3  ;;  %2724 = vmatprep.subr.bf16.mxu0 %v3023_v4 }
 0x176   : > { %v1459_v14 = vrot.slane %v1457_v13, 4  ;;  %v1114_v22 = vrot.slane %v1112_v11, 1  ;;  %v621_v29 = vsel %vm618_vm9, %v4282_v37, 0  ;;  %2693 = vmatpush3.bf16.msra.mxu1 %v3018_v0  ;;  %v1119_v52 = vrot.slane %v1117_v8, 1 }
 0x177   : > { %v1470_v51 = vsel %vm4822_vm12, %v4336_v12, %v1469_v63  ;;  %v1445_v38 = vshrl.u32 %v621_v29, 16  ;;  %v1448_v20 = vshll.u32 %v621_v29, 16  ;;  %2694 = vmatprep.subr.bf16.mxu1 %v3021_v42  ;;  %v880_v24 = vsel %vm877_vm4, %v4227_v9, 0  ;;  %vm4827_vm4 = vmmov %vm4817_vm3 }
 0x178   : > { %v1460_v54 = vor.u32 %v1459_v14, %v1456_v45  ;;  %2065 = vmatmul.mubr.bf16.gmra.mxu0 %v1470_v51  ;;  %v1115_v58 = vor.u32 %v1114_v22, %v1110_v41  ;;  %v4377_v50 = vsel %vm878_vm0, %v4282_v37, 0  ;;  %vm4382_vm11 = vcmp.ne.s16.totalorder %v2525_v55, 0  ;;  %v3035_v41 = vld [vmem:[#allocation7 + $0x1d0] sm:$0xff]   ;;  %vm4831_vm6 = vmmov %vm4827_vm4 }
 0x179   : > { %2725 = vmatpush3.bf16.msra.mxu0 %v3024_v17  ;;  %v1123_v53 = vor.u32 %v1121_v40, %v1119_v52  ;;  %v1447_v61 = vrot.slane %v1445_v38, 3  ;;  %v1450_v36 = vrot.slane %v1448_v20, 4  ;;  %v1104_v6 = vrot.slane %v880_v24, 5  ;;  %v3030_v17 = vld [vmem:[#allocation7 + $0x120] sm:$0xff]  }
 0x17a   : > { %vm4389_vm9 = vcmp.ne.s16.totalorder %v2526_v18, 0  ;;  %v1461_v30 = vsel %vm4827_vm4, %v4347_v60, %v1460_v54  ;;  %vm4828_vm0 = vsmask.f32 7424  ;;  %v1105_v55 = vrot.slane %v4377_v50, 5  ;;  %2726 = vmatprep.subr.bf16.mxu0 %v3027_v28  ;;  %2695 = vmatpush3.bf16.msra.mxu1 %v3022_v31  ;;  %v3026_v60 = vld [vmem:[#allocation7 + $0x128] sm:$0xff]   ;;  %v3036_v28 = vld [vmem:[#allocation7 + $0x190] sm:$0xff]  }
 0x17b   : > { %v1120_v44 = vsel %vm4828_vm0, %v1115_v58, %v1119_v52  ;;  %v4400_v2 = vsel %vm946_vm7, %v4227_v9, 0  ;;  %2015 = vmatprep.mubr.bf16.mxu1 %v1461_v30  ;;  %vm4829_vm3 = vmmov %vm4828_vm0  ;;  %v1451_v35 = vor.u32 %v1450_v36, %v1447_v61  ;;  %2696 = vmatprep.subr.bf16.mxu1 %v3025_v48  ;;  %v1377_v3 = vshrl.u32 %v1104_v6, 16  ;;  %v3039_v52 = vld [vmem:[#allocation7 + $0x1c8] sm:$0xff]   ;;  %v3034_v48 = vld [vmem:[#allocation7 + $0x118] sm:$0xff]  }
 0x17c   : > { %v1128_v46 = vsel %vm4829_vm3, %v1123_v53, %v4310_v33  ;;  %v1411_v26 = vshrl.u32 %v1120_v44, 16  ;;  %v1414_v18 = vshll.u32 %v1120_v44, 16  ;;  %v1106_v23 = vsel %vm1103_vm13, %v1104_v6, %v1105_v55  ;;  %vm4830_vm7 = vmmov %vm4827_vm4  ;;  %v3037_v53 = vld [vmem:[#allocation7 + $0x150] sm:$0xff]   ;;  %v3040_v30 = vld [vmem:[#allocation7 + $0x188] sm:$0xff]  }
 0x17d   : > { %v1419_v21 = vshrl.u32 %v1128_v46, 16  ;;  %v1422_v32 = vshll.u32 %v1128_v46, 16  ;;  %vm1038_vm5 = vcmp.ne.s16.totalorder %v4103_v19, 0  ;;  %v1452_v0 = vsel %vm4830_vm7, %v4354_v10, %v1451_v35  ;;  %2727 = vmatpush3.bf16.msra.mxu0 %v3028_v62 }
 0x17e   : > { %v1413_v4 = vrot.slane %v1411_v26, 3  ;;  %v1416_v56 = vrot.slane %v1414_v18, 4  ;;  %v1380_v5 = vshll.u32 %v1104_v6, 16  ;;  %v1129_v34 = vshrl.u32 %v4292_v49, 16  ;;  %2016 = vmatmul.mubr.bf16.gmra.mxu1 %v1452_v0  ;;  %2728 = vmatprep.subr.bf16.mxu0 %v3031_v15  ;;  %v3033_v49 = vld [vmem:[#allocation7 + $0x158] sm:$0xff]  }
 0x17f   : > { %v1421_v39 = vrot.slane %v1419_v21, 3  ;;  %v1424_v13 = vrot.slane %v1422_v32, 4  ;;  %v1385_v42 = vshrl.u32 %v1106_v23, 16  ;;  %2697 = vmatpush3.bf16.msra.mxu1 %v3026_v60  ;;  %v1379_v11 = vrot.slane %v1377_v3, 3  ;;  %v3038_v60 = vld [vmem:[#allocation7 + $0x110] sm:$0xff]  }
 0x180   : > { %v1382_v59 = vrot.slane %v1380_v5, 4  ;;  %v1388_v63 = vshll.u32 %v1106_v23, 16  ;;  %v950_v10 = vsel %vm947_vm1, %v4282_v37, 0  ;;  %v1417_v8 = vor.u32 %v1416_v56, %v1413_v4  ;;  %2698 = vmatprep.subr.bf16.mxu1 %v3029_v7  ;;  %vm4832_vm1 = vmmov %vm4827_vm4  ;;  %v3041_v7 = vld [vmem:[#allocation7 + $0x148] sm:$0xff]   ;;  %v3044_v5 = vld [vmem:[#allocation7 + $0x180] sm:$0xff]  }
 0x181   : > { %v4414_v40 = vor.u32 %v1424_v13, %v1421_v39  ;;  %v1387_v45 = vrot.slane %v1385_v42, 3  ;;  %v1394_v14 = vshrl.u32 %v4400_v2, 16  ;;  %v882_v22 = vsel %vm879_vm10, %v4280_v1, 0  ;;  %2729 = vmatpush3.bf16.msra.mxu0 %v3032_v16  ;;  %vm4833_vm10 = vmmov %vm4832_vm1 }
 0x182   : > { %v1390_v29 = vrot.slane %v1388_v63, 4  ;;  %v1402_v31 = vshrl.u32 %v950_v10, 16  ;;  %v1405_v51 = vshll.u32 %v950_v10, 16  ;;  %2730 = vmatprep.subr.bf16.mxu0 %v3035_v41  ;;  %v1131_v38 = vor.u32 %v1129_v34, %v4310_v33  ;;  %v3042_v41 = vld [vmem:[#allocation7 + $0x108] sm:$0xff]   ;;  %vm4834_vm12 = vmmov %vm4832_vm1 }
 0x183   : > { %v1426_v57 = vsel %vm4831_vm6, %v1417_v8, %v4414_v40  ;;  %vm948_vm14 = vcmp.ne.s16.totalorder %v4127_v25, 0  ;;  %v4427_v20 = vsel %vm4832_vm1, %v4302_v47, %v4103_v19  ;;  %v1383_v43 = vor.u32 %v1382_v59, %v1379_v11  ;;  %2699 = vmatpush3.bf16.msra.mxu1 %v3030_v17  ;;  %v3045_v17 = vld [vmem:[#allocation7 + $0x140] sm:$0xff]   ;;  %vm4839_vm4 = vmmov %vm4832_vm1 }
 0x184   : > { %2154 = vmatprep.mubr.bf16.mxu0 %v1426_v57  ;;  %v4429_v54 = vor.u32 %v1390_v29, %v1387_v45  ;;  %v1397_v58 = vshll.u32 %v4400_v2, 16  ;;  %v829_v24 = vsel %vm4382_vm11, %v4227_v9, 0  ;;  %vm1036_vm15 = vcmp.ne.s16.totalorder %v4302_v47, 0  ;;  %2700 = vmatprep.subr.bf16.mxu1 %v3033_v49  ;;  %v3043_v2 = vld [vmem:[#allocation7 + $0x1c0] sm:$0xff]   ;;  %vm4836_vm11 = vmmov %vm4832_vm1 }
 0x185   : > { %v1107_v33 = vrot.slane %v882_v22, 5  ;;  %v1396_v61 = vrot.slane %v1394_v14, 3  ;;  %v1404_v36 = vrot.slane %v1402_v31, 3  ;;  %v830_v6 = vsel %vm4389_vm9, %v4282_v37, 0  ;;  %2731 = vmatpush3.bf16.msra.mxu0 %v3036_v28  ;;  %v3046_v57 = vld [vmem:[#allocation7 + $0x100] sm:$0xff]   ;;  %vm4837_vm9 = vmmov %vm4832_vm1 }
 0x186   : > { %v1392_v62 = vsel %vm4833_vm10, %v1383_v43, %v4429_v54  ;;  %v1407_v44 = vrot.slane %v1405_v51, 4  ;;  %v1084_v15 = vshrl.u32 %v829_v24, 16  ;;  %v1087_v12 = vshll.u32 %v829_v24, 16  ;;  %2732 = vmatprep.subr.bf16.mxu0 %v3039_v52  ;;  %v3047_v24 = vld [vmem:[#allocation7 + $0x238] sm:$0xff]   ;;  %vm4840_vm0 = vmmov %vm4832_vm1 }
 0x187   : > { %2105 = vmatprep.mubr.bf16.mxu1 %v1392_v62  ;;  %v1508_v46 = vshrl.u32 %v1131_v38, 16  ;;  %v1511_v26 = vshll.u32 %v1131_v38, 16  ;;  %v1092_v18 = vshrl.u32 %v830_v6, 16  ;;  %v1095_v35 = vshll.u32 %v830_v6, 16  ;;  %2701 = vmatpush3.bf16.msra.mxu1 %v3034_v48  ;;  %vm4841_vm3 = vmmov %vm4840_vm0 }
 0x188   : > { %v1399_v21 = vrot.slane %v1397_v58, 4  ;;  %v1086_v27 = vrot.slane %v1084_v15, 4  ;;  %v1089_v32 = vrot.slane %v1087_v12, 5  ;;  %v1108_v23 = vsel %vm1103_vm13, %v1105_v55, %v1107_v33  ;;  %2702 = vmatprep.subr.bf16.mxu1 %v3037_v53 }
 0x189   : > { %v1041_v3 = vsel %vm1038_vm5, %v4280_v1, 0  ;;  %v1094_v4 = vrot.slane %v1092_v18, 4  ;;  %v1097_v56 = vrot.slane %v1095_v35, 5  ;;  %v1490_v0 = vshrl.u32 %v1108_v23, 16  ;;  %2733 = vmatpush3.bf16.msra.mxu0 %v3040_v30 }
 0x18a   : > { %v4447_v16 = vor.u32 %v1407_v44, %v1404_v36  ;;  %v1090_v34 = vor.u32 %v1089_v32, %v1086_v27  ;;  %v1493_v39 = vshll.u32 %v1108_v23, 16  ;;  %v951_v50 = vsel %vm948_vm14, %v4280_v1, 0  ;;  %2734 = vmatprep.subr.bf16.mxu0 %v3043_v2  ;;  %v3048_v44 = vld [vmem:[#allocation7 + $0x230] sm:$0xff]  }
 0x18b   : > { %v1510_v55 = vrot.slane %v1508_v46, 3  ;;  %v1513_v13 = vrot.slane %v1511_v26, 4  ;;  %v1098_v19 = vor.u32 %v1097_v56, %v1094_v4  ;;  %vm1037_vm13 = vcmp.ne.s16.totalorder %v4427_v20, 0  ;;  %2703 = vmatpush3.bf16.msra.mxu1 %v3038_v60 }
 0x18c   : > { %v4453_v42 = vrot.slane %v1041_v3, 1  ;;  %v1400_v11 = vor.u32 %v1399_v21, %v1396_v61  ;;  %v1360_v59 = vshrl.u32 %v1090_v34, 16  ;;  %v1363_v63 = vshll.u32 %v1090_v34, 16  ;;  %2704 = vmatprep.subr.bf16.mxu1 %v3041_v7  ;;  %v3049_v3 = vld [vmem:[#allocation7 + $0x228] sm:$0xff]  }
 0x18d   : > { %v1099_v10 = vsel %vm598_vm8, %v1090_v34, %v1098_v19  ;;  %v1492_v8 = vrot.slane %v1490_v0, 3  ;;  %v1495_v25 = vrot.slane %v1493_v39, 4  ;;  %v1499_v1 = vshrl.u32 %v951_v50, 16  ;;  %2735 = vmatpush3.bf16.msra.mxu0 %v3044_v5  ;;  %vm4835_vm8 = vmmov %vm4832_vm1  ;;  %v3051_v34 = vld [vmem:[#allocation7 + $0x218] sm:$0xff]   ;;  %v3053_v39 = vld [vmem:[#allocation7 + $0x208] sm:$0xff]  }
 0x18e   : > { %v1409_v45 = vsel %vm4834_vm12, %v1400_v11, %v4447_v16  ;;  %v1368_v49 = vshrl.u32 %v1099_v10, 16  ;;  %v1371_v14 = vshll.u32 %v1099_v10, 16  ;;  %v1502_v22 = vshll.u32 %v951_v50, 16  ;;  %v3057_v10 = vld [vmem:[#allocation8 + $0x28] sm:$0xff]  }
 0x18f   : > { %v1514_v29 = vor.u32 %v1513_v13, %v1510_v55  ;;  %v1362_v28 = vrot.slane %v1360_v59, 3  ;;  %v1481_v31 = vshrl.u32 %v1098_v19, 16  ;;  %v1039_v51 = vsel %vm1036_vm15, %v4227_v9, 0  ;;  %2705 = vmatpush3.bf16.msra.mxu1 %v3042_v41  ;;  %v3054_v13 = vld [vmem:[#allocation7 + $0x200] sm:$0xff]  }
 0x190   : > { %v1365_v52 = vrot.slane %v1363_v63, 4  ;;  %v1370_v38 = vrot.slane %v1368_v49, 3  ;;  %v1373_v43 = vrot.slane %v1371_v14, 4  ;;  %v1040_v48 = vsel %vm1037_vm13, %v4282_v37, 0  ;;  %2706 = vmatprep.subr.bf16.mxu1 %v3045_v17  ;;  %2155 = vmatmul.mubr.bf16.vlgmr.msra.gmra.mxu0 %v1409_v45  ;;  %v3055_v63 = vld [vmem:[#allocation8 + $0x38] sm:$0xff]   ;;  %v3056_v17 = vld [vmem:[#allocation8 + $0x30] sm:$0xff]  }
 0x191   : > { %v1515_v58 = vsel %vm4835_vm8, %v4414_v40, %v1514_v29  ;;  %v1496_v33 = vor.u32 %v1495_v25, %v1492_v8  ;;  %v1501_v53 = vrot.slane %v1499_v1, 3  ;;  %v1484_v61 = vshll.u32 %v1098_v19, 16  ;;  %2812 = vmatprep.subr.bf16.mxu0 %v3055_v63  ;;  %v3059_v8 = vld [vmem:[#allocation8 + $0x18] sm:$0xff]   ;;  %v3060_v25 = vld [vmem:[#allocation8 + $0x10] sm:$0xff]   ;;  %v3061_v1 = vld [vmem:[#allocation8 + $0x8] sm:$0xff]  }
 0x192   : > { %2162 = vmatprep.mubr.bf16.mxu0 %v1515_v58  ;;  %v1374_v9 = vor.u32 %v1373_v43, %v1370_v38  ;;  %v1504_v47 = vrot.slane %v1502_v22, 4  ;;  %v1135_v36 = vrot.slane %v1039_v51, 1  ;;  %v1136_v6 = vrot.slane %v1040_v48, 1  ;;  %2813 = vmatpush3.bf16.msra.mxu0 %v3055_v63  ;;  %v3062_v45 = vld [vmem:[#allocation8] sm:$0xff]  }
 0x193   : > { %2707 = vmatpush3.bf16.msra.mxu1 %v3046_v57  ;;  %v1366_v62 = vor.u32 %v1365_v52, %v1362_v28  ;;  %v1483_v30 = vrot.slane %v1481_v31, 3  ;;  %v1497_v26 = vsel %vm4837_vm9, %v4429_v54, %v1496_v33  ;;  %v1486_v35 = vrot.slane %v1484_v61, 4  ;;  %v3050_v54 = vld [vmem:[#allocation7 + $0x220] sm:$0xff]   ;;  %2814 = vmatprep.subr.bf16.mxu0 %v3056_v17 }
 0x194   : > { %v1137_v20 = vsel %vm1068_vm2, %v1135_v36, %v1136_v6  ;;  %v1139_v37 = vsel %vm1068_vm2, %v1136_v6, %v4453_v42  ;;  %2792 = vmatprep.subr.bf16.mxu1 %v3047_v24  ;;  %v1505_v18 = vor.u32 %v1504_v47, %v1501_v53  ;;  %vm4838_vm2 = vmmov %vm4832_vm1  ;;  %v1517_v50 = vshrl.u32 %v4453_v42, 16 }
 0x195   : > { %v1428_v40 = vshrl.u32 %v1137_v20, 16  ;;  %v1431_v15 = vshll.u32 %v1137_v20, 16  ;;  %v1436_v12 = vshrl.u32 %v1139_v37, 16  ;;  %v1439_v2 = vshll.u32 %v1139_v37, 16 }
 0x196   : > { %v1375_v46 = vsel %vm4836_vm11, %v1366_v62, %v1374_v9  ;;  %v1506_v23 = vsel %vm4838_vm2, %v4447_v16, %v1505_v18  ;;  %v1487_v7 = vor.u32 %v1486_v35, %v1483_v30  ;;  %v3052_v16 = vld [vmem:[#allocation7 + $0x210] sm:$0xff]   ;;  %v1520_v55 = vshll.u32 %v4453_v42, 16  ;;  %2815 = vmatpush3.bf16.msra.mxu0 %v3056_v17  ;;  %v3058_v42 = vld [vmem:[#allocation8 + $0x20] sm:$0xff]  }
 0x197   : > { %2106 = vmatmul.mubr.bf16.vlgmr.msra.gmra.mxu1 %v1375_v46  ;;  %v1430_v60 = vrot.slane %v1428_v40, 3  ;;  %v1433_v21 = vrot.slane %v1431_v15, 4  ;;  %v1438_v27 = vrot.slane %v1436_v12, 3  ;;  %v1441_v32 = vrot.slane %v1439_v2, 4  ;;  %2816 = vmatprep.subr.bf16.mxu0 %v3057_v10  ;;  %v2536_v46 = vld [vmem:[%s4568_s4] ss:$0 sm:$0xff] }
 0x198   : > { %2113 = vmatprep.mubr.bf16.mxu1 %v1497_v26  ;;  %2793 = vmatpush3.bf16.msra.mxu1 %v3047_v24  ;;  %v1488_v0 = vsel %vm4839_vm4, %v1374_v9, %v1487_v7  ;;  %v1519_v19 = vrot.slane %v1517_v50, 3  ;;  %v1522_v41 = vrot.slane %v1520_v55, 4 }
 0x199   : > { %2794 = vmatprep.subr.bf16.mxu1 %v3048_v44  ;;  %2163 = vmatmul.mubr.bf16.gmra.mxu0 %v1506_v23  ;;  %v1434_v4 = vor.u32 %v1433_v21, %v1430_v60  ;;  %v1442_v56 = vor.u32 %v1441_v32, %v1438_v27 }
 0x19a   : > { %v1523_v11 = vor.u32 %v1522_v41, %v1519_v19  ;;  %2817 = vmatpush3.bf16.msra.mxu0 %v3057_v10 }
 0x19b   : > { %v1443_v5 = vsel %vm4840_vm0, %v1434_v4, %v1442_v56  ;;  %2818 = vmatprep.subr.bf16.mxu0 %v3058_v42 }
 0x19c   : > { %2795 = vmatpush3.bf16.msra.mxu1 %v3048_v44  ;;  %v1524_v59 = vsel %vm4841_vm3, %v1442_v56, %v1523_v11 }
 0x19d   : > { %2796 = vmatprep.subr.bf16.mxu1 %v3049_v3 }
 0x19e   : > { %2819 = vmatpush3.bf16.msra.mxu0 %v3058_v42 }
 0x19f   : > { %2114 = vmatmul.mubr.bf16.gmra.mxu1 %v1488_v0  ;;  %2820 = vmatprep.subr.bf16.mxu0 %v3059_v8 }
 0x1a0   : > { %2797 = vmatpush3.bf16.msra.mxu1 %v3049_v3  ;;  %2808 = vmatprep.mubr.bf16.mxu1 %v1443_v5 }
 0x1a1   : > { %2798 = vmatprep.subr.bf16.mxu1 %v3050_v54 }
 0x1a2   : > { %2821 = vmatpush3.bf16.msra.mxu0 %v3059_v8 }
 0x1a3   : > { %2822 = vmatprep.subr.bf16.mxu0 %v3060_v25 }
 0x1a4   : > { %2799 = vmatpush3.bf16.msra.mxu1 %v3050_v54 }
 0x1a5   : > { %2800 = vmatprep.subr.bf16.mxu1 %v3051_v34 }
 0x1a6   : > { %2823 = vmatpush3.bf16.msra.mxu0 %v3060_v25 }
 0x1a7   : > { %2824 = vmatprep.subr.bf16.mxu0 %v3061_v1 }
 0x1a8   : > { %2801 = vmatpush3.bf16.msra.mxu1 %v3051_v34 }
 0x1a9   : > { %2802 = vmatprep.subr.bf16.mxu1 %v3052_v16 }
 0x1aa   : > { %2825 = vmatpush3.bf16.msra.mxu0 %v3061_v1 }
 0x1ab   : > { %2826 = vmatprep.subr.bf16.mxu0 %v3062_v45 }
 0x1ac   : > { %2803 = vmatpush3.bf16.msra.mxu1 %v3052_v16 }
 0x1ad   : > { %2804 = vmatprep.subr.bf16.mxu1 %v3053_v39 }
 0x1ae   : > { %2827 = vmatpush3.bf16.msra.mxu0 %v3062_v45 }
 0x1b0   : > { %2805 = vmatpush3.bf16.msra.mxu1 %v3053_v39 }
 0x1b1   : > { %2806 = vmatprep.subr.bf16.mxu1 %v3054_v13 }
 0x1b4   : > { %2807 = vmatpush3.bf16.msra.mxu1 %v3054_v13 }
 0x1b7   : > { %2809 = vmatmul.mubr.bf16.vlgmr.msra.gmra.mxu1 %v1524_v59 }
 0x22f   : > { %v2680_v14 = vpop.f32.mrf.mxu0 }
 0x231   : > { %v2681_v29 = vpop.f32.mrf.mxu0 }
 0x232   : > { %v2682_v32 = vadd.f32 %v2681_v29, %v2680_v14 }
 0x233   : > { %v2683_v31 = vpop.f32.mrf.mxu0 }
 0x235   : > { %v2652_v49 = vpop.f32.mrf.mxu1  ;;  %v2684_v57 = vpop.f32.mrf.mxu0 }
 0x236   : > { %v2685_v34 = vadd.f32 %v2684_v57, %v2683_v31 }
 0x237   : > { %v2653_v22 = vpop.f32.mrf.mxu1 }
 0x238   : > { %v2686_v38 = vpop.f32.mrf.mxu0  ;;  %v2654_v12 = vadd.f32 %v2653_v22, %v2652_v49 }
 0x239   : > { %v2655_v28 = vpop.f32.mrf.mxu1 }
 0x23a   : > { %v2687_v48 = vpop.f32.mrf.mxu0  ;;  %v2010_v21 = vadd.f32 %v2654_v12, %v2536_v46 }
 0x23b   : > { %v2656_v51 = vpop.f32.mrf.mxu1  ;;  %v2688_v0 = vadd.f32 %v2687_v48, %v2686_v38 }
 0x23c   : > { %v2689_v24 = vpop.f32.mrf.mxu0  ;;  %v2657_v35 = vadd.f32 %v2656_v51, %v2655_v28  ;;  %v2059_v16 = vadd.f32 %v2682_v32, %v2010_v21 }
 0x23e   : > { %v2658_v52 = vpop.f32.mrf.mxu1  ;;  %v2690_v53 = vpop.f32.mrf.mxu0  ;;  %v2013_v7 = vadd.f32 %v2657_v35, %v2536_v46  ;;  %v3066_v35 = vld [vmem:[%s3535_s9 + $0x18] sm:$0xff] }
 0x23f   : > { %v2691_v4 = vadd.f32 %v2690_v53, %v2689_v24  ;;  %v2609_v53 = vld [vmem:[%s4842_s5] ss:$0 sm:$0xff] }
 0x240   : > { %v2659_v43 = vpop.f32.mrf.mxu1  ;;  %v2062_v41 = vadd.f32 %v2685_v34, %v2013_v7 }
 0x241   : > { %v2660_v26 = vadd.f32 %v2659_v43, %v2658_v52 }
 0x242   : > { %v2661_v58 = vpop.f32.mrf.mxu1 }
 0x243   : > { %v2018_v23 = vadd.f32 %v2660_v26, %v2536_v46 }
 0x244   : > { %v2662_v33 = vpop.f32.mrf.mxu1 }
 0x245   : > { %v2663_v2 = vadd.f32 %v2662_v33, %v2661_v58  ;;  %v2067_v55 = vadd.f32 %v2688_v0, %v2018_v23 }
 0x247   : > { %v2021_v27 = vadd.f32 %v2663_v2, %v2536_v46  ;;  %v3065_v2 = vld [vmem:[%s3535_s9 + $0x28] sm:$0xff] }
 0x249   : > { %v2070_v50 = vadd.f32 %v2691_v4, %v2021_v27 }
 0x250   : > { %v2736_v9 = vpop.f32.mrf.mxu0 }
 0x252   : > { %v2737_v6 = vpop.f32.mrf.mxu0 }
 0x253   : > { %v2738_v17 = vadd.f32 %v2737_v6, %v2736_v9 }
 0x254   : > { %v2739_v30 = vpop.f32.mrf.mxu0 }
 0x256   : > { %v2740_v37 = vpop.f32.mrf.mxu0 }
 0x257   : > { %v2708_v61 = vpop.f32.mrf.mxu1  ;;  %v2741_v1 = vadd.f32 %v2740_v37, %v2739_v30  ;;  %v3064_v37 = vld [vmem:[%s3535_s9 + $0x10] sm:$0xff] }
 0x259   : > { %v2709_v47 = vpop.f32.mrf.mxu1  ;;  %v2742_v40 = vpop.f32.mrf.mxu0 }
 0x25a   : > { %v2710_v56 = vadd.f32 %v2709_v47, %v2708_v61 }
 0x25b   : > { %v2711_v36 = vpop.f32.mrf.mxu1  ;;  %v2743_v18 = vpop.f32.mrf.mxu0 }
 0x25c   : > { %v2108_v19 = vadd.f32 %v2710_v56, %v2059_v16  ;;  %v2744_v8 = vadd.f32 %v2743_v18, %v2742_v40 }
 0x25d   : > { %v2712_v62 = vpop.f32.mrf.mxu1  ;;  %v2745_v3 = vpop.f32.mrf.mxu0 }
 0x25e   : > { %v2713_v39 = vadd.f32 %v2712_v62, %v2711_v36  ;;  %v2157_v45 = vadd.f32 %v2738_v17, %v2108_v19  ;;  %v3063_v36 = vld [vmem:[%s3535_s9 + $0x20] sm:$0xff]  ;;  %s3312_s9 = smov [#allocation10]  }
 0x25f   : > { %v2714_v20 = vpop.f32.mrf.mxu1  ;;  %v2746_v13 = vpop.f32.mrf.mxu0  ;;  %s3177_s27 = sshll.u32 %s3312_s9, 4  ;;  %s3178_s27 = int_to_ptr.vmem [resolvable:$false] %s3177_s27 }
 0x260   : > { %v2111_v10 = vadd.f32 %v2713_v39, %v2062_v41  ;;  %v2747_v42 = vadd.f32 %v2746_v13, %v2745_v3  ;;  %s3179_s24 = scalar_lea.vmem %s3178_s27, 1024  ;;  %p3180_p9 = scmp.lt.s32.totalorder %s4495_s23, %s3178_s27 }
 0x261   : > { %v2715_v44 = vpop.f32.mrf.mxu1  ;;  %p3181_p12 = scmp.lt.s32.totalorder %s3179_s24, %s3173_s19 }
 0x262   : > { %v2716_v5 = vadd.f32 %v2715_v44, %v2714_v20  ;;  %v2160_v31 = vadd.f32 %v2741_v1, %v2111_v10 }
 0x263   : > { %v2717_v15 = vpop.f32.mrf.mxu1  ;;  %p3182_p2 = por %p3181_p12, %p3180_p9 }
 0x264   : > { %v2116_v59 = vadd.f32 %v2716_v5, %v2067_v55 }
 0x265   : > { %v2718_v60 = vpop.f32.mrf.mxu1  ;;  %p3183_p1 = pnand %p3182_p2, %p3176_p10 }
 0x266   : > { %v2719_v54 = vadd.f32 %v2718_v60, %v2717_v15  ;;  %v2165_v14 = vadd.f32 %v2744_v8, %v2116_v59 }
 0x268   : > { %v2119_v11 = vadd.f32 %v2719_v54, %v2070_v50 }
 0x26a   : > { %v2168_v49 = vadd.f32 %v2747_v42, %v2119_v11 }
 0x277   : > { %v2810_v63 = vpop.f32.mrf.mxu1 }
 0x278   : > { %v2214_v51 = vadd.f32 %v2810_v63, %v2165_v14 }
 0x279   : > { %v2205_v25 = vpop.f32.mrf.mxu1 }
 0x27a   : > { %v2206_v29 = vadd.f32 %v2205_v25, %v2157_v45  ;;  %v2222_v58 = vmax.f32 %v2214_v51, 0.0 }
 0x27b   : > { %v2811_v22 = vpop.f32.mrf.mxu1 }
 0x27c   : > { %v2217_v28 = vadd.f32 %v2811_v22, %v2168_v49  ;;  %v2220_v43 = vmax.f32 %v2206_v29, 0.0 }
 0x27d   : > { %v2208_v57 = vpop.f32.mrf.mxu1 }
 0x27e   : > { %v2209_v52 = vadd.f32 %v2208_v57, %v2160_v31  ;;  %v2223_v38 = vmax.f32 %v2217_v28, 0.0 }
 0x280   : > { %v2221_v48 = vmax.f32 %v2209_v52, 0.0  ;;  %v2225_v33 = vpack.c.bf16 %v2223_v38, %v2222_v58 }
 0x282   : > { %v2224_v24 = vpack.c.bf16 %v2221_v48, %v2220_v43 }
 0x284   : > { %2828 = vmatprep.mubr.bf16.mxu0 %v2224_v24 }
 0x285   : > { %2829 = vmatmul.mubr.bf16.vlgmr.msra.gmra.mxu0 %v2225_v33 }
 0x345   : > { %v2830_v61 = vpop.f32.mrf.mxu0 }
 0x346   : > { %v2340_v9 = vadd.f32 %v2830_v61, %v2609_v53 }
 0x347   : > { %v2331_v47 = vpop.f32.mrf.mxu0 }
 0x348   : > { %v2348_v6 = vadd.f32 %v3063_v36, %v2340_v9  ;;  %v2332_v62 = vadd.f32 %v2609_v53, %v2331_v47 }
 0x349   : > { %v2831_v30 = vpop.f32.mrf.mxu0 }
 0x34a   : > { %v2352_v20 = vmax.f32 %v2348_v6, 0.0  ;;  %v2346_v44 = vadd.f32 %v3064_v37, %v2332_v62  ;;  %v2343_v40 = vadd.f32 %v2831_v30, %v2609_v53 }
 0x34b   : > { %v2334_v15 = vpop.f32.mrf.mxu0 }
 0x34c   : > { %2356 = vst [vmem:[%s354_s20 + $0x10] sm:$0xff] %v2352_v20  ;;  %v2350_v12 = vmax.f32 %v2346_v44, 0.0  ;;  %v2349_v46 = vadd.f32 %v3065_v2, %v2343_v40  ;;  %v2335_v26 = vadd.f32 %v2609_v53, %v2334_v15 }
 0x34e   : > { %2354 = vst [vmem:[%s354_s20] sm:$0xff] %v2350_v12  ;;  %v2353_v18 = vmax.f32 %v2349_v46, 0.0  ;;  %v2347_v60 = vadd.f32 %v3066_v35, %v2335_v26 }
 0x350   : > { %2357 = vst [vmem:[%s354_s20 + $0x18] sm:$0xff] %v2353_v18  ;;  %v2351_v21 = vmax.f32 %v2347_v60, 0.0 }
 0x352   : > { %2355 = vst [vmem:[%s354_s20 + $0x8] sm:$0xff] %v2351_v21 }
 0x353   : > { %3186 = shalt.err (!%p3183_p1)
}
 0x354   : > { %s3187_s12 = scalar_lea.hbm %s4500_s14, 512  ;;  %s3191_s5 = scalar_lea.hbm %s4844_s6, 8192 }
 0x355   : > { %p3188_p3 = scmp.ne.s32.totalorder %s4500_s14, %s3187_s12  ;;  %p3192_p4 = scmp.lt.s32.totalorder %s4500_s14, %s4844_s6 }
 0x356   : > { %p3193_p6 = scmp.lt.s32.totalorder %s3191_s5, %s3187_s12 }
 0x357   : > { %p3189_p7 = pnand %p3188_p3, %p4845_p5 }
 0x358   : > { %p3194_p13 = por %p3193_p6, %p3192_p4 }
 0x359   : > { %p3190_p0 = pneg %p3189_p7 }
 0x35b   : > { %p3195_p11 = pnand %p3194_p13, %p3190_p0 }
 0x35d   : > { %3198 = shalt.err (!%p3195_p11)
}
 0x35e   : > { %s3313_s13 = smov 128   ;;  %s3314_s20 = smov 8  }
 0x35f   : > { %2849 = dma.vmem_to_hbm [thread:$0]  (%p4845_p5), %s4495_s23, 512, %s4500_s14, %s4504_s16, %s3313_s13, %s3313_s13, %s3314_s20  }
 0x360 PF: > { %s4846_s8 = sld [smem:[#allocation15_spill]]  ;;  %p2876_p8 = scmp.ge.s32.totalorder %s3301_s11, 2 }
 0x361   : > { %s4847_s30 = sld [smem:[#allocation18_spill]] }
 0x366   : > { %s2389_s18 = sand.u32 1, %s4846_s8  }
 0x367   : > { %p4848_p10 = scmp.ne.s32.totalorder %s4847_s30, 0  ;;  %s2390_s19 = scalar_lea.sflag [#allocation4], %s2389_s18 }
 0x369   : > { %p2866_p9 = pnand %p2876_p8, %p4848_p10 }
 0x36b   : > { %p2867_p12 = pneg %p2866_p9 }
 0x36d   : > { %3256 = dma.done.wait (%p2867_p12), %s2390_s19, 512  }
 0x36e   : > { %3258 = vsyncadd (%p2867_p12), %s2390_s19, 4294966784  ;;  %s25_s11 = sadd.s32 1, %s3301_s11   ;;  %s4849_s30 = sld [smem:[#allocation16_spill]] }
 0x36f   : > { %p22_p2 = scmp.ge.s32.totalorder %s25_s11, 18   ;;  %s4850_s9 = sld [smem:[#allocation19_spill]] }
 0x370   : > { %s4851_s23 = sld [smem:[#allocation20_spill]]  ;;  %s4852_s24 = smov %s3265_s25 }
 0x371   : > { %s4853_s25 = smov %s3269_s26  ;;  %s4854_s26 = smov %s3502_s3 }
 0x372   : > { %s4855_s27 = smov %s3277_s28  ;;  %s4856_s28 = smov %s3281_s29 }
 0x373   : > { %s4857_s29 = smov %s3497_s21  ;;  %s4858_s8 = smov %s3297_s10 }
 0x374   :  { %24 = sbr.rel (!%p22_p2) target bundleno = 17 (0x11), region = 106 }
 0x376   : > { %s4859_s10 = smov %s4851_s23 }
 0x379   :  { %2395 = vsyncpa [#allocation3], 1 }
 0x37a   :  { %2397 = vsyncpa [#allocation3 + $0x1], 1 }
 0x37b   :  { %2398 = vsyncpa [#allocation6], 1 }
 0x37c   :  { %2399 = vsyncpa [#allocation9], 1 }
 0x37d   :  { %2400 = vsyncpa [#allocation4], 1 }
 0x37e   :  { %2402 = vsyncpa [#allocation4 + $0x1], 1 }

</bundles_post_ra>
